<compile_context>
chip_gen: v7x
topology: tpu7x:2x2x1
jax: 0.10.0
libtpu: 0.0.40
codegen_flags: <defaults>
</compile_context>

<pallas_src>
import functools

import jax
import jax.numpy as jnp
from jax.experimental import pallas as pl
from jax.experimental.pallas import tpu as pltpu


# ---------------------------------------------------------------------------
# Kernels
# ---------------------------------------------------------------------------

def _dbp_proj_kernel(x_ref, wgt_ref, bgt_ref, w1_ref, d_ref, z1_ref):
    """z1 = (relu(x @ Wgt + bgt) @ W1) * d^{-1/2}   (row-tiled, bf16 out)."""
    h0 = jnp.dot(x_ref[...], wgt_ref[...], preferred_element_type=jnp.float32)
    h0 = jnp.maximum(h0 + bgt_ref[...], 0.0)   # bias + ReLU in f32 (dropout = id in eval)
    z1 = jnp.dot(h0.astype(jnp.bfloat16), w1_ref[...],
                 preferred_element_type=jnp.float32)
    # Pre-scale rows by d^{-1/2} for the next aggregation pass.
    z1_ref[...] = (z1 * d_ref[...]).astype(z1_ref.dtype)


def _agg_relu_proj_kernel(a_ref, z_ref, b_ref, w_ref, d_ref, out_ref, acc_ref):
    """out = (relu(d * ((A+I) @ z) + b) @ W) * d   accumulated over the k axis."""
    k = pl.program_id(1)

    @pl.when(k == 0)
    def _():
        acc_ref[...] = jnp.zeros_like(acc_ref)

    # int8 (A+I) tile widened to bf16 on the VPU (hidden under the DMA), then
    # bf16 x bf16 MXU matmul with f32 accumulation.
    acc_ref[...] += jnp.dot(a_ref[...].astype(jnp.bfloat16), z_ref[...],
                            preferred_element_type=jnp.float32)

    @pl.when(k == pl.num_programs(1) - 1)
    def _():
        # Finish conv1: post-scale rows by d_i^{-1/2}, add bias, ReLU (all f32).
        h = jnp.maximum(acc_ref[...] * d_ref[...] + b_ref[...], 0.0)
        # conv2 linear transform + pre-scale rows for the next aggregation pass.
        z2 = jnp.dot(h.astype(jnp.bfloat16), w_ref[...],
                     preferred_element_type=jnp.float32)
        out_ref[...] = (z2 * d_ref[...]).astype(out_ref.dtype)


def _agg_softmax_kernel(a_ref, z_ref, b_ref, d_ref, out_ref):
    """out = softmax(d * ((A+I) @ z) + b)   accumulated directly into out_ref."""
    k = pl.program_id(1)

    @pl.when(k == 0)
    def _():
        out_ref[...] = jnp.zeros_like(out_ref)

    # Output block index is (i, 0) for every k, so out_ref is resident: accumulate
    # straight into it (no VMEM scratch needed).
    out_ref[...] += jnp.dot(a_ref[...].astype(jnp.bfloat16), z_ref[...],
                            preferred_element_type=jnp.float32)

    @pl.when(k == pl.num_programs(1) - 1)
    def _():
        h = out_ref[...] * d_ref[...] + b_ref[...]
        m = jnp.max(h, axis=-1, keepdims=True)
        e = jnp.exp(h - m)
        inv = pl.reciprocal(jnp.sum(e, axis=-1, keepdims=True), approx=True)
        # NOTE: out_dim < 128 -> masked partial stores; output traffic is tiny
        # relative to the (A+I) stream, so no padded-slab trick needed here.
        out_ref[...] = e * inv


# ---------------------------------------------------------------------------
# Glue
# ---------------------------------------------------------------------------

def _round_up(x, m):
    return ((x + m - 1) // m) * m


def _pick_tile(n_pad, candidates, min_blocks=1):
    for c in candidates:
        if n_pad % c == 0 and n_pad // c >= min_blocks:
            return c
    return n_pad


def _vmem_limit_bytes():
    # Size against the real chip: v7x only has 64 MiB physical VMEM per TC,
    # v5e/v6e have 128 MiB.  Our footprint is a few MiB, so this is headroom.
    try:
        cap = pltpu.get_tpu_info().vmem_capacity_bytes
    except Exception:
        cap = 64 * 1024 * 1024
    return min(int(cap * 3 // 4), 96 * 1024 * 1024)


def adjacency_and_norm(edge_index, num_nodes):
    """(A + I) with duplicate-edge multiplicity, and D^{-1/2} of its row sums.

    PyG flow='source_to_target' aggregates src -> dst, so the dense operator has
    A[dst, src]; the GCN propagation is D^{-1/2} (A + I) D^{-1/2} (X @ W) + b.
    """
    src, dst = edge_index[0], edge_index[1]
    a = jnp.zeros((num_nodes, num_nodes), jnp.float32)
    a = a.at[dst, src].add(1.0)
    a = a + jnp.eye(num_nodes, dtype=jnp.float32)           # self loops
    deg = jnp.sum(a, axis=1)
    d_inv_sqrt = jnp.where(deg > 0, jax.lax.rsqrt(deg), 0.0)
    return a, d_inv_sqrt


@jax.jit
def dbpgcn_forward(x, edge_index, params):
    n, in_dim = x.shape
    hidden = params["wgt"].shape[1]
    od2 = params["w1"].shape[1]          # 2 * out_dim
    od = params["w2"].shape[1]           # out_dim

    # --- tiling (all static; shapes are known at trace time) -------------------
    # Pad N to a multiple of 128 (lane rule); for larger graphs pad to 512 so the
    # big reduction-axis tiles divide evenly.  Padded rows/cols are zero.
    pad_unit = 128 if n <= 512 else 512
    n_pad = _round_up(n, pad_unit)
    # Reduction-axis (adjacency column) tile: big, so the multi-MiB A DMA
    # dominates the ~0.35us per-grid-step overhead (HBM-roofline regime).
    tile_k = _pick_tile(n_pad, (4096, 2048, 1024, 512, 256, 128))
    # Row tile: keep >= 2 row blocks when possible so the "parallel" axis
    # actually shards across the two TensorCores on v7x.
    tile_m = _pick_tile(n_pad, (512, 256, 128), min_blocks=2)
    # Pass A has near-zero compute per row: use the large tile to cut step count.
    tile_a = tile_k

    n_m = n_pad // tile_m
    n_k = n_pad // tile_k
    vmem_limit = _vmem_limit_bytes()

    # --- wrapper-side preprocessing --------------------------------------------
    # TODO(synk): for O(N)-edge graphs this dense N x N scatter-add / stream
    # should become block-sparse aggregation via a scalar-prefetched block-id
    # table; kept dense here for generality.
    a_plus_i, d_inv_sqrt = adjacency_and_norm(edge_index, n)
    # Stream (A + I) at 1 byte/element (multiplicities are exact small ints;
    # int8 is fine unless an edge repeats > 127 times).  D^{-1/2} is applied as
    # cheap per-row scalings inside the kernels instead.
    a_i8 = jnp.pad(a_plus_i, ((0, n_pad - n), (0, n_pad - n))).astype(jnp.int8)
    d_p = jnp.pad(d_inv_sqrt, (0, n_pad - n)).reshape(n_pad, 1)

    x_p = jnp.pad(x, ((0, n_pad - n), (0, 0))).astype(jnp.bfloat16)
    wgt = params["wgt"].astype(jnp.bfloat16)
    w1 = params["w1"].astype(jnp.bfloat16)
    w2 = params["w2"].astype(jnp.bfloat16)

    # ---- Pass A: z1 = (relu(x @ Wgt + bgt) @ W1) * d^{-1/2}  (row-tiled) -------
    z1 = pl.pallas_call(
        _dbp_proj_kernel,
        out_shape=jax.ShapeDtypeStruct((n_pad, od2), jnp.bfloat16),
        grid=(n_pad // tile_a,),
        in_specs=[
            pl.BlockSpec((tile_a, in_dim), lambda i: (i, 0)),
            pl.BlockSpec((in_dim, hidden), lambda i: (0, 0)),
            pl.BlockSpec((1, hidden), lambda i: (0, 0)),
            pl.BlockSpec((hidden, od2), lambda i: (0, 0)),
            pl.BlockSpec((tile_a, 1), lambda i: (i, 0)),
        ],
        out_specs=pl.BlockSpec((tile_a, od2), lambda i: (i, 0)),
        compiler_params=pltpu.CompilerParams(
            dimension_semantics=("parallel",),
            vmem_limit_bytes=vmem_limit),
    )(x_p, wgt, params["bgt"], w1, d_p)

    # ---- Pass B: z2 = (relu(d*((A+I)@z1) + b1) @ W2) * d  (row x k, f32 acc) ---
    z2 = pl.pallas_call(
        _agg_relu_proj_kernel,
        out_shape=jax.ShapeDtypeStruct((n_pad, od), jnp.bfloat16),
        grid=(n_m, n_k),
        in_specs=[
            pl.BlockSpec((tile_m, tile_k), lambda i, k: (i, k)),   # (A+I) int8
            pl.BlockSpec((tile_k, od2), lambda i, k: (k, 0)),      # z1 (bf16, pre-scaled)
            pl.BlockSpec((1, od2), lambda i, k: (0, 0)),           # b1 (f32)
            pl.BlockSpec((od2, od), lambda i, k: (0, 0)),          # W2 (bf16)
            pl.BlockSpec((tile_m, 1), lambda i, k: (i, 0)),        # d^{-1/2} rows (f32)
        ],
        out_specs=pl.BlockSpec((tile_m, od), lambda i, k: (i, 0)),
        scratch_shapes=[pltpu.VMEM((tile_m, od2), jnp.float32)],
        compiler_params=pltpu.CompilerParams(
            dimension_semantics=("parallel", "arbitrary"),
            vmem_limit_bytes=vmem_limit),
    )(a_i8, z1, params["b1"], w2, d_p)

    # ---- Pass C: out = softmax(d*((A+I)@z2) + b2)  (row x k, acc into out) -----
    out = pl.pallas_call(
        _agg_softmax_kernel,
        out_shape=jax.ShapeDtypeStruct((n_pad, od), jnp.float32),
        grid=(n_m, n_k),
        in_specs=[
            pl.BlockSpec((tile_m, tile_k), lambda i, k: (i, k)),   # (A+I) int8
            pl.BlockSpec((tile_k, od), lambda i, k: (k, 0)),       # z2 (bf16, pre-scaled)
            pl.BlockSpec((1, od), lambda i, k: (0, 0)),            # b2 (f32)
            pl.BlockSpec((tile_m, 1), lambda i, k: (i, 0)),        # d^{-1/2} rows (f32)
        ],
        out_specs=pl.BlockSpec((tile_m, od), lambda i, k: (i, 0)),
        compiler_params=pltpu.CompilerParams(
            dimension_semantics=("parallel", "arbitrary"),
            vmem_limit_bytes=vmem_limit),
    )(a_i8, z2, params["b2"], d_p)

    return out[:n]


def init_params(key, in_dim, hidden_dim, out_dim):
    ks = jax.random.split(key, 3)

    def glorot(k, fan_in, fan_out):
        scale = jnp.sqrt(6.0 / (fan_in + fan_out))
        return jax.random.uniform(k, (fan_in, fan_out), jnp.float32, -scale, scale)

    return {
        # GraphTransformer stand-in: in_dim -> hidden_dim
        "wgt": glorot(ks[0], in_dim, hidden_dim),
        "bgt": jnp.zeros((1, hidden_dim), jnp.float32),
        # conv1: hidden_dim -> 2*out_dim
        "w1": glorot(ks[1], hidden_dim, 2 * out_dim),
        "b1": jnp.zeros((1, 2 * out_dim), jnp.float32),
        # conv2: 2*out_dim -> out_dim
        "w2": glorot(ks[2], 2 * out_dim, out_dim),
        "b2": jnp.zeros((1, out_dim), jnp.float32),
    }


def reference_forward(x, edge_index, params):
    """Pure-JAX f32 reference of the same forward pass."""
    a_plus_i, d_inv_sqrt = adjacency_and_norm(edge_index, x.shape[0])
    a_hat = d_inv_sqrt[:, None] * a_plus_i * d_inv_sqrt[None, :]
    h0 = jnp.maximum(x @ params["wgt"] + params["bgt"], 0.0)
    h1 = jnp.maximum(a_hat @ (h0 @ params["w1"]) + params["b1"], 0.0)
    h2 = a_hat @ (h1 @ params["w2"]) + params["b2"]
    return jax.nn.softmax(h2, axis=-1)


if __name__ == "__main__":
    key = jax.random.PRNGKey(0)
    k_x, k_p = jax.random.split(key)

    num_nodes = 32
    in_dim = 16
    hidden_dim = 32
    out_dim = 8

    # Node features [N, in_dim]
    x = jax.random.normal(k_x, (num_nodes, in_dim), jnp.float32)

    # Deterministic ring graph (both directions): edge_index [2, 2*N]
    src = jnp.arange(num_nodes)
    dst = (src + 1) % num_nodes
    edge_index = jnp.stack([jnp.concatenate([src, dst]),
                            jnp.concatenate([dst, src])])

    params = init_params(k_p, in_dim, hidden_dim, out_dim)

    out = dbpgcn_forward(x, edge_index, params)
    out = jax.block_until_ready(out)

    assert out.shape == (num_nodes, out_dim)
    # softmax rows sum to 1 (pl.reciprocal(approx=True) -> ~1e-4 relative error)
    assert jnp.allclose(jnp.sum(out, axis=-1), 1.0, atol=5e-3)

    # Compare against the f32 pure-JAX reference (bf16 weights / intermediates,
    # int8 adjacency with f32 normalization, approx reciprocal).
    ref = reference_forward(x, edge_index, params)
    assert jnp.allclose(out, ref, atol=3e-2), float(jnp.max(jnp.abs(out - ref)))

    print("KERNEL_OK")
</pallas_src>

<mosaic_0001>
module attributes {stable_mosaic.version = 11 : i64} {
  func.func private @main(%arg0: i32) attributes {dimension_semantics = [#tpu.dimension_semantics<core_parallel>], iteration_bounds = array<i64: 2>, tpu.core_type = #tpu.core_type<sc_scalar_subcore>, window_params = []} {
    return
  }
}

module attributes {stable_mosaic.version = 11 : i64} {
  func.func private @main(%arg0: i32) attributes {dimension_semantics = [#tpu.dimension_semantics<core_parallel>], iteration_bounds = array<i64: 2>, tpu.core_type = #tpu.core_type<sc_scalar_subcore>, window_params = []} {
    return
  }
}

module attributes {stable_mosaic.version = 11 : i64} {
  func.func @_dbp_proj_kernel(%arg0: i32, %arg1: memref<128x16xbf16, #tpu.memory_space<vmem>>, %arg2: memref<16x32xbf16, #tpu.memory_space<vmem>>, %arg3: memref<1x32xf32, #tpu.memory_space<vmem>>, %arg4: memref<32x16xbf16, #tpu.memory_space<vmem>>, %arg5: memref<128x1xf32, #tpu.memory_space<vmem>>, %arg6: memref<128x16xbf16, #tpu.memory_space<vmem>>) attributes {dimension_semantics = [#tpu.dimension_semantics<parallel>], iteration_bounds = array<i64: 1>, scalar_prefetch = 0 : i64, scratch_operands = 0 : i64, tpu.core_type = #tpu.core_type<tc>, window_params = [{transform_indices = @transform_0, window_bounds = array<i64: 128, 16>}, {pipeline_mode = #tpu.pipeline_mode<synchronous>, transform_indices = @transform_1, window_bounds = array<i64: 16, 32>}, {pipeline_mode = #tpu.pipeline_mode<synchronous>, transform_indices = @transform_2, window_bounds = array<i64: 1, 32>}, {pipeline_mode = #tpu.pipeline_mode<synchronous>, transform_indices = @transform_3, window_bounds = array<i64: 32, 16>}, {transform_indices = @transform_4, window_bounds = array<i64: 128, 1>}, {transform_indices = @transform_5, window_bounds = array<i64: 128, 16>}]} {
    %c0 = arith.constant 0 : index
    %c0_0 = arith.constant 0 : index
    %0 = vector.load %arg1[%c0, %c0_0] : memref<128x16xbf16, #tpu.memory_space<vmem>>, vector<128x16xbf16>
    %c0_1 = arith.constant 0 : index
    %c0_2 = arith.constant 0 : index
    %1 = vector.load %arg2[%c0_1, %c0_2] : memref<16x32xbf16, #tpu.memory_space<vmem>>, vector<16x32xbf16>
    %cst = arith.constant dense<0.000000e+00> : vector<128x32xf32>
    %2 = tpu.matmul %0, %1, %cst {dimension_numbers = #tpu.dot_dimension_numbers<[1], [0], [0], [1], [0, 0, 1, 1], [], []>} : vector<128x16xbf16>, vector<16x32xbf16>, vector<128x32xf32> -> vector<128x32xf32>
    %c0_3 = arith.constant 0 : index
    %c0_4 = arith.constant 0 : index
    %3 = vector.load %arg3[%c0_3, %c0_4] : memref<1x32xf32, #tpu.memory_space<vmem>>, vector<1x32xf32>
    %4 = vector.broadcast %3 : vector<1x32xf32> to vector<128x32xf32>
    %5 = arith.addf %2, %4 : vector<128x32xf32>
    %cst_5 = arith.constant 0.000000e+00 : f32
    %6 = vector.broadcast %cst_5 : f32 to vector<128x32xf32>
    %7 = arith.maximumf %5, %6 : vector<128x32xf32>
    %8 = arith.truncf %7 : vector<128x32xf32> to vector<128x32xbf16>
    %c0_6 = arith.constant 0 : index
    %c0_7 = arith.constant 0 : index
    %9 = vector.load %arg4[%c0_6, %c0_7] : memref<32x16xbf16, #tpu.memory_space<vmem>>, vector<32x16xbf16>
    %cst_8 = arith.constant dense<0.000000e+00> : vector<128x16xf32>
    %10 = tpu.matmul %8, %9, %cst_8 {dimension_numbers = #tpu.dot_dimension_numbers<[1], [0], [0], [1], [0, 0, 1, 1], [], []>} : vector<128x32xbf16>, vector<32x16xbf16>, vector<128x16xf32> -> vector<128x16xf32>
    %c0_9 = arith.constant 0 : index
    %c0_10 = arith.constant 0 : index
    %11 = vector.load %arg5[%c0_9, %c0_10] : memref<128x1xf32, #tpu.memory_space<vmem>>, vector<128x1xf32>
    %12 = vector.broadcast %11 : vector<128x1xf32> to vector<128x16xf32>
    %13 = arith.mulf %10, %12 : vector<128x16xf32>
    %14 = arith.truncf %13 : vector<128x16xf32> to vector<128x16xbf16>
    %c0_11 = arith.constant 0 : index
    %c0_12 = arith.constant 0 : index
    %15 = vector.load %arg6[%c0_11, %c0_12] : memref<128x16xbf16, #tpu.memory_space<vmem>>, vector<128x16xbf16>
    tpu.vector_store %arg6[%c0_11, %c0_12], %14 {strides = array<i32>} : memref<128x16xbf16, #tpu.memory_space<vmem>>, vector<128x16xbf16>,
    return
  }
  func.func @transform_0(%arg0: i32) -> (i32, i32) {
    %c0_i32 = arith.constant 0 : i32
    %c0_i32_0 = arith.constant 0 : i32
    return %arg0, %c0_i32 : i32, i32
  }
  func.func @transform_1(%arg0: i32) -> (i32, i32) {
    %c0_i32 = arith.constant 0 : i32
    %c0_i32_0 = arith.constant 0 : i32
    %c0_i32_1 = arith.constant 0 : i32
    return %c0_i32, %c0_i32_0 : i32, i32
  }
  func.func @transform_2(%arg0: i32) -> (i32, i32) {
    %c0_i32 = arith.constant 0 : i32
    %c0_i32_0 = arith.constant 0 : i32
    %c0_i32_1 = arith.constant 0 : i32
    return %c0_i32, %c0_i32_0 : i32, i32
  }
  func.func @transform_3(%arg0: i32) -> (i32, i32) {
    %c0_i32 = arith.constant 0 : i32
    %c0_i32_0 = arith.constant 0 : i32
    %c0_i32_1 = arith.constant 0 : i32
    return %c0_i32, %c0_i32_0 : i32, i32
  }
  func.func @transform_4(%arg0: i32) -> (i32, i32) {
    %c0_i32 = arith.constant 0 : i32
    %c0_i32_0 = arith.constant 0 : i32
    return %arg0, %c0_i32 : i32, i32
  }
  func.func @transform_5(%arg0: i32) -> (i32, i32) {
    %c0_i32 = arith.constant 0 : i32
    %c0_i32_0 = arith.constant 0 : i32
    return %arg0, %c0_i32 : i32, i32
  }
}

module attributes {stable_mosaic.version = 11 : i64} {
  func.func @_agg_relu_proj_kernel(%arg0: i32, %arg1: i32, %arg2: memref<128x128xi8, #tpu.memory_space<vmem>>, %arg3: memref<128x16xbf16, #tpu.memory_space<vmem>>, %arg4: memref<1x16xf32, #tpu.memory_space<vmem>>, %arg5: memref<16x8xbf16, #tpu.memory_space<vmem>>, %arg6: memref<128x1xf32, #tpu.memory_space<vmem>>, %arg7: memref<128x8xbf16, #tpu.memory_space<vmem>>, %arg8: memref<128x16xf32, #tpu.memory_space<vmem>>) attributes {dimension_semantics = [#tpu.dimension_semantics<parallel>, #tpu.dimension_semantics<arbitrary>], iteration_bounds = array<i64: 1, 1>, scalar_prefetch = 0 : i64, scratch_operands = 1 : i64, tpu.core_type = #tpu.core_type<tc>, window_params = [{transform_indices = @transform_0, window_bounds = array<i64: 128, 128>}, {transform_indices = @transform_1, window_bounds = array<i64: 128, 16>}, {pipeline_mode = #tpu.pipeline_mode<synchronous>, transform_indices = @transform_2, window_bounds = array<i64: 1, 16>}, {pipeline_mode = #tpu.pipeline_mode<synchronous>, transform_indices = @transform_3, window_bounds = array<i64: 16, 8>}, {transform_indices = @transform_4, window_bounds = array<i64: 128, 1>}, {transform_indices = @transform_5, window_bounds = array<i64: 128, 8>}]} {
    %c0_i32 = arith.constant 0 : i32
    %0 = arith.cmpi eq, %arg1, %c0_i32 : i32
    %1 = arith.extui %0 : i1 to i32
    %c0_i32_0 = arith.constant 0 : i32
    %2 = arith.cmpi ne, %1, %c0_i32_0 : i32
    scf.if %2 {
      %cst_10 = arith.constant 0.000000e+00 : f32
      %13 = vector.broadcast %cst_10 : f32 to vector<128x16xf32>
      %c0_11 = arith.constant 0 : index
      %c0_12 = arith.constant 0 : index
      %14 = vector.load %arg8[%c0_11, %c0_12] : memref<128x16xf32, #tpu.memory_space<vmem>>, vector<128x16xf32>
      tpu.vector_store %arg8[%c0_11, %c0_12], %13 {strides = array<i32>} : memref<128x16xf32, #tpu.memory_space<vmem>>, vector<128x16xf32>,
    } else {
    }
    %c0 = arith.constant 0 : index
    %c0_1 = arith.constant 0 : index
    %3 = vector.load %arg8[%c0, %c0_1] : memref<128x16xf32, #tpu.memory_space<vmem>>, vector<128x16xf32>
    %c0_2 = arith.constant 0 : index
    %c0_3 = arith.constant 0 : index
    %4 = vector.load %arg2[%c0_2, %c0_3] : memref<128x128xi8, #tpu.memory_space<vmem>>, vector<128x128xi8>
    %5 = arith.sitofp %4 : vector<128x128xi8> to vector<128x128xbf16>
    %c0_4 = arith.constant 0 : index
    %c0_5 = arith.constant 0 : index
    %6 = vector.load %arg3[%c0_4, %c0_5] : memref<128x16xbf16, #tpu.memory_space<vmem>>, vector<128x16xbf16>
    %cst = arith.constant dense<0.000000e+00> : vector<128x16xf32>
    %7 = tpu.matmul %5, %6, %cst {dimension_numbers = #tpu.dot_dimension_numbers<[1], [0], [0], [1], [0, 0, 1, 1], [], []>} : vector<128x128xbf16>, vector<128x16xbf16>, vector<128x16xf32> -> vector<128x16xf32>
    %8 = arith.addf %3, %7 : vector<128x16xf32>
    %c0_6 = arith.constant 0 : index
    %c0_7 = arith.constant 0 : index
    %9 = vector.load %arg8[%c0_6, %c0_7] : memref<128x16xf32, #tpu.memory_space<vmem>>, vector<128x16xf32>
    tpu.vector_store %arg8[%c0_6, %c0_7], %8 {strides = array<i32>} : memref<128x16xf32, #tpu.memory_space<vmem>>, vector<128x16xf32>,
    %c0_i32_8 = arith.constant 0 : i32
    %10 = arith.cmpi eq, %arg1, %c0_i32_8 : i32
    %11 = arith.extui %10 : i1 to i32
    %c0_i32_9 = arith.constant 0 : i32
    %12 = arith.cmpi ne, %11, %c0_i32_9 : i32
    scf.if %12 {
      %c0_10 = arith.constant 0 : index
      %c0_11 = arith.constant 0 : index
      %13 = vector.load %arg8[%c0_10, %c0_11] : memref<128x16xf32, #tpu.memory_space<vmem>>, vector<128x16xf32>
      %c0_12 = arith.constant 0 : index
      %c0_13 = arith.constant 0 : index
      %14 = vector.load %arg6[%c0_12, %c0_13] : memref<128x1xf32, #tpu.memory_space<vmem>>, vector<128x1xf32>
      %15 = vector.broadcast %14 : vector<128x1xf32> to vector<128x16xf32>
      %16 = arith.mulf %13, %15 : vector<128x16xf32>
      %c0_14 = arith.constant 0 : index
      %c0_15 = arith.constant 0 : index
      %17 = vector.load %arg4[%c0_14, %c0_15] : memref<1x16xf32, #tpu.memory_space<vmem>>, vector<1x16xf32>
      %18 = vector.broadcast %17 : vector<1x16xf32> to vector<128x16xf32>
      %19 = arith.addf %16, %18 : vector<128x16xf32>
      %cst_16 = arith.constant 0.000000e+00 : f32
      %20 = vector.broadcast %cst_16 : f32 to vector<128x16xf32>
      %21 = arith.maximumf %19, %20 : vector<128x16xf32>
      %22 = arith.truncf %21 : vector<128x16xf32> to vector<128x16xbf16>
      %c0_17 = arith.constant 0 : index
      %c0_18 = arith.constant 0 : index
      %23 = vector.load %arg5[%c0_17, %c0_18] : memref<16x8xbf16, #tpu.memory_space<vmem>>, vector<16x8xbf16>
      %cst_19 = arith.constant dense<0.000000e+00> : vector<128x8xf32>
      %24 = tpu.matmul %22, %23, %cst_19 {dimension_numbers = #tpu.dot_dimension_numbers<[1], [0], [0], [1], [0, 0, 1, 1], [], []>} : vector<128x16xbf16>, vector<16x8xbf16>, vector<128x8xf32> -> vector<128x8xf32>
      %c0_20 = arith.constant 0 : index
      %c0_21 = arith.constant 0 : index
      %25 = vector.load %arg6[%c0_20, %c0_21] : memref<128x1xf32, #tpu.memory_space<vmem>>, vector<128x1xf32>
      %26 = vector.broadcast %25 : vector<128x1xf32> to vector<128x8xf32>
      %27 = arith.mulf %24, %26 : vector<128x8xf32>
      %28 = arith.truncf %27 : vector<128x8xf32> to vector<128x8xbf16>
      %c0_22 = arith.constant 0 : index
      %c0_23 = arith.constant 0 : index
      %29 = vector.load %arg7[%c0_22, %c0_23] : memref<128x8xbf16, #tpu.memory_space<vmem>>, vector<128x8xbf16>
      tpu.vector_store %arg7[%c0_22, %c0_23], %28 {strides = array<i32>} : memref<128x8xbf16, #tpu.memory_space<vmem>>, vector<128x8xbf16>,
    } else {
    }
    return
  }
  func.func @transform_0(%arg0: i32, %arg1: i32) -> (i32, i32) {
    %c0_i32 = arith.constant 0 : i32
    return %arg0, %arg1 : i32, i32
  }
  func.func @transform_1(%arg0: i32, %arg1: i32) -> (i32, i32) {
    %c0_i32 = arith.constant 0 : i32
    %c0_i32_0 = arith.constant 0 : i32
    return %arg1, %c0_i32 : i32, i32
  }
  func.func @transform_2(%arg0: i32, %arg1: i32) -> (i32, i32) {
    %c0_i32 = arith.constant 0 : i32
    %c0_i32_0 = arith.constant 0 : i32
    %c0_i32_1 = arith.constant 0 : i32
    return %c0_i32, %c0_i32_0 : i32, i32
  }
  func.func @transform_3(%arg0: i32, %arg1: i32) -> (i32, i32) {
    %c0_i32 = arith.constant 0 : i32
    %c0_i32_0 = arith.constant 0 : i32
    %c0_i32_1 = arith.constant 0 : i32
    return %c0_i32, %c0_i32_0 : i32, i32
  }
  func.func @transform_4(%arg0: i32, %arg1: i32) -> (i32, i32) {
    %c0_i32 = arith.constant 0 : i32
    %c0_i32_0 = arith.constant 0 : i32
    return %arg0, %c0_i32 : i32, i32
  }
  func.func @transform_5(%arg0: i32, %arg1: i32) -> (i32, i32) {
    %c0_i32 = arith.constant 0 : i32
    %c0_i32_0 = arith.constant 0 : i32
    return %arg0, %c0_i32 : i32, i32
  }
}

module attributes {stable_mosaic.version = 11 : i64} {
  func.func @_agg_softmax_kernel(%arg0: i32, %arg1: i32, %arg2: memref<128x128xi8, #tpu.memory_space<vmem>>, %arg3: memref<128x8xbf16, #tpu.memory_space<vmem>>, %arg4: memref<1x8xf32, #tpu.memory_space<vmem>>, %arg5: memref<128x1xf32, #tpu.memory_space<vmem>>, %arg6: memref<128x8xf32, #tpu.memory_space<vmem>>) attributes {dimension_semantics = [#tpu.dimension_semantics<parallel>, #tpu.dimension_semantics<arbitrary>], iteration_bounds = array<i64: 1, 1>, scalar_prefetch = 0 : i64, scratch_operands = 0 : i64, tpu.core_type = #tpu.core_type<tc>, window_params = [{transform_indices = @transform_0, window_bounds = array<i64: 128, 128>}, {transform_indices = @transform_1, window_bounds = array<i64: 128, 8>}, {pipeline_mode = #tpu.pipeline_mode<synchronous>, transform_indices = @transform_2, window_bounds = array<i64: 1, 8>}, {transform_indices = @transform_3, window_bounds = array<i64: 128, 1>}, {transform_indices = @transform_4, window_bounds = array<i64: 128, 8>}]} {
    %c0_i32 = arith.constant 0 : i32
    %0 = arith.cmpi eq, %arg1, %c0_i32 : i32
    %1 = arith.extui %0 : i1 to i32
    %c0_i32_0 = arith.constant 0 : i32
    %2 = arith.cmpi ne, %1, %c0_i32_0 : i32
    scf.if %2 {
      %cst_10 = arith.constant 0.000000e+00 : f32
      %13 = vector.broadcast %cst_10 : f32 to vector<128x8xf32>
      %c0_11 = arith.constant 0 : index
      %c0_12 = arith.constant 0 : index
      %14 = vector.load %arg6[%c0_11, %c0_12] : memref<128x8xf32, #tpu.memory_space<vmem>>, vector<128x8xf32>
      tpu.vector_store %arg6[%c0_11, %c0_12], %13 {strides = array<i32>} : memref<128x8xf32, #tpu.memory_space<vmem>>, vector<128x8xf32>,
    } else {
    }
    %c0 = arith.constant 0 : index
    %c0_1 = arith.constant 0 : index
    %3 = vector.load %arg6[%c0, %c0_1] : memref<128x8xf32, #tpu.memory_space<vmem>>, vector<128x8xf32>
    %c0_2 = arith.constant 0 : index
    %c0_3 = arith.constant 0 : index
    %4 = vector.load %arg2[%c0_2, %c0_3] : memref<128x128xi8, #tpu.memory_space<vmem>>, vector<128x128xi8>
    %5 = arith.sitofp %4 : vector<128x128xi8> to vector<128x128xbf16>
    %c0_4 = arith.constant 0 : index
    %c0_5 = arith.constant 0 : index
    %6 = vector.load %arg3[%c0_4, %c0_5] : memref<128x8xbf16, #tpu.memory_space<vmem>>, vector<128x8xbf16>
    %cst = arith.constant dense<0.000000e+00> : vector<128x8xf32>
    %7 = tpu.matmul %5, %6, %cst {dimension_numbers = #tpu.dot_dimension_numbers<[1], [0], [0], [1], [0, 0, 1, 1], [], []>} : vector<128x128xbf16>, vector<128x8xbf16>, vector<128x8xf32> -> vector<128x8xf32>
    %8 = arith.addf %3, %7 : vector<128x8xf32>
    %c0_6 = arith.constant 0 : index
    %c0_7 = arith.constant 0 : index
    %9 = vector.load %arg6[%c0_6, %c0_7] : memref<128x8xf32, #tpu.memory_space<vmem>>, vector<128x8xf32>
    tpu.vector_store %arg6[%c0_6, %c0_7], %8 {strides = array<i32>} : memref<128x8xf32, #tpu.memory_space<vmem>>, vector<128x8xf32>,
    %c0_i32_8 = arith.constant 0 : i32
    %10 = arith.cmpi eq, %arg1, %c0_i32_8 : i32
    %11 = arith.extui %10 : i1 to i32
    %c0_i32_9 = arith.constant 0 : i32
    %12 = arith.cmpi ne, %11, %c0_i32_9 : i32
    scf.if %12 {
      %c0_10 = arith.constant 0 : index
      %c0_11 = arith.constant 0 : index
      %13 = vector.load %arg6[%c0_10, %c0_11] : memref<128x8xf32, #tpu.memory_space<vmem>>, vector<128x8xf32>
      %c0_12 = arith.constant 0 : index
      %c0_13 = arith.constant 0 : index
      %14 = vector.load %arg5[%c0_12, %c0_13] : memref<128x1xf32, #tpu.memory_space<vmem>>, vector<128x1xf32>
      %15 = vector.broadcast %14 : vector<128x1xf32> to vector<128x8xf32>
      %16 = arith.mulf %13, %15 : vector<128x8xf32>
      %c0_14 = arith.constant 0 : index
      %c0_15 = arith.constant 0 : index
      %17 = vector.load %arg4[%c0_14, %c0_15] : memref<1x8xf32, #tpu.memory_space<vmem>>, vector<1x8xf32>
      %18 = vector.broadcast %17 : vector<1x8xf32> to vector<128x8xf32>
      %19 = arith.addf %16, %18 : vector<128x8xf32>
      %cst_16 = arith.constant dense<0xFF800000> : vector<128xf32>
      %20 = vector.multi_reduction <maximumf>, %19, %cst_16 [1] : vector<128x8xf32> to vector<128xf32>
      %21 = vector.shape_cast %20 : vector<128xf32> to vector<128x1xf32>
      %22 = vector.broadcast %21 : vector<128x1xf32> to vector<128x8xf32>
      %23 = arith.subf %19, %22 : vector<128x8xf32>
      %24 = math.exp %23 : vector<128x8xf32>
      %cst_17 = arith.constant dense<0.000000e+00> : vector<128xf32>
      %25 = vector.multi_reduction <add>, %24, %cst_17 [1] : vector<128x8xf32> to vector<128xf32>
      %26 = vector.shape_cast %25 : vector<128xf32> to vector<128x1xf32>
      %27 = tpu.reciprocal %26 {approx = true} : vector<128x1xf32> -> vector<128x1xf32>
      %28 = vector.broadcast %27 : vector<128x1xf32> to vector<128x8xf32>
      %29 = arith.mulf %24, %28 : vector<128x8xf32>
      %c0_18 = arith.constant 0 : index
      %c0_19 = arith.constant 0 : index
      %30 = vector.load %arg6[%c0_18, %c0_19] : memref<128x8xf32, #tpu.memory_space<vmem>>, vector<128x8xf32>
      tpu.vector_store %arg6[%c0_18, %c0_19], %29 {strides = array<i32>} : memref<128x8xf32, #tpu.memory_space<vmem>>, vector<128x8xf32>,
    } else {
    }
    return
  }
  func.func @transform_0(%arg0: i32, %arg1: i32) -> (i32, i32) {
    %c0_i32 = arith.constant 0 : i32
    return %arg0, %arg1 : i32, i32
  }
  func.func @transform_1(%arg0: i32, %arg1: i32) -> (i32, i32) {
    %c0_i32 = arith.constant 0 : i32
    %c0_i32_0 = arith.constant 0 : i32
    return %arg1, %c0_i32 : i32, i32
  }
  func.func @transform_2(%arg0: i32, %arg1: i32) -> (i32, i32) {
    %c0_i32 = arith.constant 0 : i32
    %c0_i32_0 = arith.constant 0 : i32
    %c0_i32_1 = arith.constant 0 : i32
    return %c0_i32, %c0_i32_0 : i32, i32
  }
  func.func @transform_3(%arg0: i32, %arg1: i32) -> (i32, i32) {
    %c0_i32 = arith.constant 0 : i32
    %c0_i32_0 = arith.constant 0 : i32
    return %arg0, %c0_i32 : i32, i32
  }
  func.func @transform_4(%arg0: i32, %arg1: i32) -> (i32, i32) {
    %c0_i32 = arith.constant 0 : i32
    %c0_i32_0 = arith.constant 0 : i32
    return %arg0, %c0_i32 : i32, i32
  }
}

</mosaic_0001>

<bundles_post_ra>
// kernel: dbpgcn_forward.3
= control target key start
LH: loop header
LB: loop body
LE: loop exit
PB: predicated region body
PF: predicated region fallthrough
CT: control target
= control target key end

     0   :  { %vm92_vm0 = vcmask 130048   ;;  %v704_v11 = vmov 0   ;;  %vm254_vm1 = vcmask 261120   ;;  %vm552_vm2 = vcmask 125952   ;;  %s899_s1 = inlined_call_operand.vmem [shape: bf16[16,32], index: 1, kind: input, shape index: {}]   ;;  %s900_s0 = inlined_call_operand.vmem [shape: bf16[128,16], index: 0, kind: input, shape index: {}]   ;;  %s901_s3 = inlined_call_operand.vmem [shape: bf16[32,16], index: 3, kind: input, shape index: {}]   ;;  %s902_s4 = inlined_call_operand.vmem [shape: f32[128,1], index: 4, kind: input, shape index: {}]   ;;  %s903_s2 = inlined_call_operand.vmem [shape: f32[1,32], index: 2, kind: input, shape index: {}]   ;;  %s904_s5 = inlined_call_operand.vmem [shape: bf16[128,16], index: 5, kind: output, shape index: {}]  }
   0x1   :  { %v693_v0 = vld [vmem:[%s899_s1] sm:$0xff]   ;;  %v695_v2 = vld [vmem:[%s900_s0 + $0x8] sm:$0xff]   ;;  %v696_v3 = vld [vmem:[%s900_s0 + $0x10] sm:$0xff]   ;;  %692 = vset.pattern.permute.xlu1 %v704_v11  ;;  %691 = vset.pattern.permute.xlu0 %v704_v11 }
   0x2   :  { %v694_v1 = vld [vmem:[%s900_s0] sm:$0xff]   ;;  %652 = vmatprep.subr.bf16.mxu0 %v693_v0  ;;  %v697_v4 = vld [vmem:[%s900_s0 + $0x18] sm:$0xff]   ;;  %v699_v6 = vld [vmem:[%s900_s0 + $0x28] sm:$0xff]  }
   0x3   :  { %653 = vmatpush3.bf16.msra.mxu0 %v693_v0  ;;  %654 = vmatprep.mubr.msk.bf16.mxu0 %vm92_vm0, %v694_v1  ;;  %v698_v5 = vld [vmem:[%s900_s0 + $0x20] sm:$0xff]   ;;  %v700_v7 = vld [vmem:[%s900_s0 + $0x30] sm:$0xff]   ;;  %v701_v8 = vld [vmem:[%s900_s0 + $0x38] sm:$0xff]  }
   0x4   :  { %v702_v9 = vld [vmem:[%s901_s3] sm:$0xff]   ;;  %v703_v10 = vld [vmem:[%s901_s3 + $0x8] sm:$0xff]   ;;  %v378_v12 = vld [vmem:[%s902_s4 + $0x10] sm:$0xff] }
   0x5   :  { %670 = vmatprep.subr.bf16.mxu1 %v702_v9  ;;  %v376_v13 = vld [vmem:[%s902_s4] sm:$0xff]  ;;  %404 = vperm.xlu1 %692, %v378_v12   ;;  %v379_v14 = vld [vmem:[%s902_s4 + $0x18] sm:$0xff]  ;;  %v377_v15 = vld [vmem:[%s902_s4 + $0x8] sm:$0xff] }
   0x6   :  { %655 = vmatmul.mubr.msk.bf16.vlgmr.msra.gmra.mrb[0].mxu0 %vm92_vm0, %v695_v2  ;;  %671 = vmatpush3.bf16.msra.mxu1 %v702_v9  ;;  %v381_v16 = vld [vmem:[%s902_s4 + $0x28] sm:$0xff]  ;;  %v380_v17 = vld [vmem:[%s902_s4 + $0x20] sm:$0xff]  ;;  %v383_v18 = vld [vmem:[%s902_s4 + $0x38] sm:$0xff] }
   0x7   :  { %658 = vmatprep.mubr.msk.bf16.mxu0 %vm92_vm0, %v696_v3  ;;  %672 = vmatprep.subr.bf16.mxu1 %v703_v10  ;;  %v382_v19 = vld [vmem:[%s902_s4 + $0x30] sm:$0xff]  ;;  %v385_v20 = vld [vmem:[%s902_s4 + $0x48] sm:$0xff]  ;;  %v384_v21 = vld [vmem:[%s902_s4 + $0x40] sm:$0xff] }
   0x8   :  { %394 = vperm.xlu0 %691, %v376_v13   ;;  %v387_v22 = vld [vmem:[%s902_s4 + $0x58] sm:$0xff]  ;;  %v386_v23 = vld [vmem:[%s902_s4 + $0x50] sm:$0xff]  ;;  %v389_v24 = vld [vmem:[%s902_s4 + $0x68] sm:$0xff] }
   0x9   :  { %409 = vperm.xlu1 %692, %v379_v14   ;;  %v388_v25 = vld [vmem:[%s902_s4 + $0x60] sm:$0xff]  ;;  %v391_v26 = vld [vmem:[%s902_s4 + $0x78] sm:$0xff]  ;;  %v390_v27 = vld [vmem:[%s902_s4 + $0x70] sm:$0xff] }
   0xa   :  { %673 = vmatpush3.bf16.msra.mxu1 %v703_v10  ;;  %v573_v28 = vld [vmem:[%s903_s2] ss:$0 sm:$0xff] }
   0xc   :  { %399 = vperm.xlu0 %691, %v377_v15  }
   0xd   :  { %419 = vperm.xlu1 %692, %v381_v16  }
   0xe   :  { %659 = vmatmul.mubr.msk.bf16.gmra.mrb[4].mxu0 %vm92_vm0, %v697_v4 }
   0xf   :  { %662 = vmatprep.mubr.msk.bf16.mxu0 %vm92_vm0, %v698_v5 }
  0x10   :  { %414 = vperm.xlu0 %691, %v380_v17  }
  0x11   :  { %429 = vperm.xlu1 %692, %v383_v18  }
  0x14   :  { %424 = vperm.xlu0 %691, %v382_v19  }
  0x15   :  { %439 = vperm.xlu1 %692, %v385_v20  }
  0x16   :  { %663 = vmatmul.mubr.msk.bf16.gmra.mrb[8].mxu0 %vm92_vm0, %v699_v6 }
  0x17   :  { %666 = vmatprep.mubr.msk.bf16.mxu0 %vm92_vm0, %v700_v7 }
  0x18   :  { %434 = vperm.xlu0 %691, %v384_v21  }
  0x19   :  { %449 = vperm.xlu1 %692, %v387_v22  }
  0x1c   :  { %444 = vperm.xlu0 %691, %v386_v23  }
  0x1d   :  { %459 = vperm.xlu1 %692, %v389_v24  }
  0x1e   :  { %667 = vmatmul.mubr.msk.bf16.gmra.mrb[12].mxu0 %vm92_vm0, %v701_v8 }
  0x20   :  { %454 = vperm.xlu0 %691, %v388_v25  }
  0x21   :  { %469 = vperm.xlu1 %692, %v391_v26  }
  0x24   :  { %464 = vperm.xlu0 %691, %v390_v27  }
  0x84   :  { %v405_v22 = vpop.permute.xlu1 %404 }
  0x87   :  { %v395_v21 = vpop.permute.xlu0 %394 }
  0x88   :  { %v410_v24 = vpop.permute.xlu1 %409 }
  0x8b   :  { %v400_v23 = vpop.permute.xlu0 %399 }
  0x8c   :  { %v420_v26 = vpop.permute.xlu1 %419 }
  0x8f   :  { %v415_v25 = vpop.permute.xlu0 %414 }
  0x93   :  { %v425_v27 = vpop.permute.xlu0 %424 }
  0xd9   :  { %v656_v29 = vpop.f32.mrb[0].mxu0 }
  0xda   :  { %v160_v30 = vadd.f32 %v656_v29, %v573_v28  ;;  %v151_v31 = vpop.f32.mrb[1].mxu0 }
  0xdb   :  { %v152_v32 = vadd.f32 %v573_v28, %v151_v31  ;;  %v657_v33 = vpop.f32.mrb[2].mxu0  ;;  %v430_v31 = vpop.permute.xlu1 %429 }
  0xdc   :  { %v163_v34 = vadd.f32 %v657_v33, %v573_v28  ;;  %v154_v35 = vpop.f32.mrb[3].mxu0  ;;  %v216_v37 = vmax.f32 %v160_v30, 0.0 }
  0xdd   :  { %v155_v36 = vadd.f32 %v573_v28, %v154_v35  ;;  %v214_v39 = vmax.f32 %v152_v32, 0.0 }
  0xde   :  { %v217_v38 = vmax.f32 %v163_v34, 0.0 }
  0xdf   :  { %v215_v40 = vmax.f32 %v155_v36, 0.0 }
  0xe0   :  { %v231_v41 = vpack.c.bf16 %v217_v38, %v216_v37 }
  0xe1   :  { %v660_v42 = vpop.f32.mrb[4].mxu0  ;;  %v230_v43 = vpack.c.bf16 %v215_v40, %v214_v39  ;;  %v435_v40 = vpop.permute.xlu0 %434 }
  0xe2   :  { %v176_v44 = vadd.f32 %v660_v42, %v573_v28  ;;  %v167_v45 = vpop.f32.mrb[5].mxu0  ;;  %v440_v42 = vpop.permute.xlu1 %439 }
  0xe3   :  { %v168_v46 = vadd.f32 %v573_v28, %v167_v45  ;;  %v661_v47 = vpop.f32.mrb[6].mxu0  ;;  %674 = vmatprep.mubr.msk.bf16.mxu1 %vm254_vm1, %v230_v43 }
  0xe4   :  { %v179_v48 = vadd.f32 %v661_v47, %v573_v28  ;;  %v170_v49 = vpop.f32.mrb[7].mxu0  ;;  %675 = vmatmul.mubr.msk.bf16.vlgmr.msra.gmra.mrb[0].mxu1 %vm254_vm1, %v231_v41  ;;  %v220_v51 = vmax.f32 %v176_v44, 0.0 }
  0xe5   :  { %v171_v50 = vadd.f32 %v573_v28, %v170_v49  ;;  %v218_v53 = vmax.f32 %v168_v46, 0.0 }
  0xe6   :  { %v221_v52 = vmax.f32 %v179_v48, 0.0 }
  0xe7   :  { %v219_v54 = vmax.f32 %v171_v50, 0.0 }
  0xe8   :  { %v233_v55 = vpack.c.bf16 %v221_v52, %v220_v51  ;;  %v445_v51 = vpop.permute.xlu0 %444 }
  0xe9   :  { %v232_v56 = vpack.c.bf16 %v219_v54, %v218_v53  ;;  %v664_v57 = vpop.f32.mrb[8].mxu0 }
  0xea   :  { %v192_v58 = vadd.f32 %v664_v57, %v573_v28  ;;  %v183_v59 = vpop.f32.mrb[9].mxu0 }
  0xeb   :  { %v184_v60 = vadd.f32 %v573_v28, %v183_v59  ;;  %v665_v61 = vpop.f32.mrb[10].mxu0  ;;  %678 = vmatprep.mubr.msk.bf16.mxu1 %vm254_vm1, %v232_v56 }
  0xec   :  { %v195_v62 = vadd.f32 %v665_v61, %v573_v28  ;;  %v186_v63 = vpop.f32.mrb[11].mxu0  ;;  %679 = vmatmul.mubr.msk.bf16.gmra.mrb[4].mxu1 %vm254_vm1, %v233_v55  ;;  %v224_v1 = vmax.f32 %v192_v58, 0.0  ;;  %v450_v55 = vpop.permute.xlu1 %449 }
  0xed   :  { %v187_v0 = vadd.f32 %v573_v28, %v186_v63  ;;  %v222_v3 = vmax.f32 %v184_v60, 0.0  ;;  %v455_v60 = vpop.permute.xlu0 %454 }
  0xee   :  { %v225_v2 = vmax.f32 %v195_v62, 0.0 }
  0xef   :  { %v223_v4 = vmax.f32 %v187_v0, 0.0 }
  0xf0   :  { %v235_v5 = vpack.c.bf16 %v225_v2, %v224_v1  ;;  %v460_v2 = vpop.permute.xlu1 %459 }
  0xf1   :  { %v234_v6 = vpack.c.bf16 %v223_v4, %v222_v3  ;;  %v668_v7 = vpop.f32.mrb[12].mxu0 }
  0xf2   :  { %v208_v8 = vadd.f32 %v668_v7, %v573_v28  ;;  %v199_v9 = vpop.f32.mrb[13].mxu0  ;;  %v465_v7 = vpop.permute.xlu0 %464 }
  0xf3   :  { %v200_v10 = vadd.f32 %v573_v28, %v199_v9  ;;  %v669_v11 = vpop.f32.mrb[14].mxu0  ;;  %682 = vmatprep.mubr.msk.bf16.mxu1 %vm254_vm1, %v234_v6 }
  0xf4   :  { %v211_v12 = vadd.f32 %v669_v11, %v573_v28  ;;  %v202_v13 = vpop.f32.mrb[15].mxu0  ;;  %683 = vmatmul.mubr.msk.bf16.gmra.mrb[8].mxu1 %vm254_vm1, %v235_v5  ;;  %v228_v15 = vmax.f32 %v208_v8, 0.0  ;;  %v470_v11 = vpop.permute.xlu1 %469 }
  0xf5   :  { %v203_v14 = vadd.f32 %v573_v28, %v202_v13  ;;  %v226_v17 = vmax.f32 %v200_v10, 0.0 }
  0xf6   :  { %v229_v16 = vmax.f32 %v211_v12, 0.0 }
  0xf7   :  { %v227_v18 = vmax.f32 %v203_v14, 0.0 }
  0xf8   :  { %v237_v19 = vpack.c.bf16 %v229_v16, %v228_v15 }
  0xf9   :  { %v236_v20 = vpack.c.bf16 %v227_v18, %v226_v17 }
  0xfb   :  { %686 = vmatprep.mubr.msk.bf16.mxu1 %vm254_vm1, %v236_v20 }
  0xfc   :  { %687 = vmatmul.mubr.msk.bf16.gmra.mrb[12].mxu1 %vm254_vm1, %v237_v19 }
 0x1b7   :  { %v676_v29 = vpop.f32.mrb[0].mxu1 }
 0x1b8   :  { %v474_v30 = vmul.f32 %v676_v29, %v405_v22  ;;  %v313_v28 = vpop.f32.mrb[1].mxu1 }
 0x1b9   :  { %v472_v32 = vmul.f32 %v395_v21, %v313_v28  ;;  %v677_v33 = vpop.f32.mrb[2].mxu1 }
 0x1ba   :  { %v619_v34 = vpack.c.bf16 %v474_v30, %v474_v30  ;;  %v475_v35 = vmul.f32 %v677_v33, %v410_v24  ;;  %v316_v36 = vpop.f32.mrb[3].mxu1 }
 0x1bb   :  { %v617_v37 = vpack.c.bf16 %v472_v32, %v472_v32  ;;  %v473_v38 = vmul.f32 %v400_v23, %v316_v36 }
 0x1bc   :  { %555 = vst.msk [vmem:[%s904_s5 + $0x8] sm:$0xf] %vm552_vm2, %v619_v34  ;;  %v620_v39 = vpack.c.bf16 %v475_v35, %v475_v35 }
 0x1bd   :  { %553 = vst.msk [vmem:[%s904_s5] sm:$0xf] %vm552_vm2, %v617_v37  ;;  %v618_v41 = vpack.c.bf16 %v473_v38, %v473_v38 }
 0x1be   :  { %556 = vst.msk [vmem:[%s904_s5 + $0xc] sm:$0xf] %vm552_vm2, %v620_v39 }
 0x1bf   :  { %554 = vst.msk [vmem:[%s904_s5 + $0x4] sm:$0xf] %vm552_vm2, %v618_v41  ;;  %v680_v43 = vpop.f32.mrb[4].mxu1 }
 0x1c0   :  { %v478_v44 = vmul.f32 %v680_v43, %v425_v27  ;;  %v329_v45 = vpop.f32.mrb[5].mxu1 }
 0x1c1   :  { %v476_v46 = vmul.f32 %v415_v25, %v329_v45  ;;  %v681_v47 = vpop.f32.mrb[6].mxu1 }
 0x1c2   :  { %v623_v48 = vpack.c.bf16 %v478_v44, %v478_v44  ;;  %v479_v49 = vmul.f32 %v681_v47, %v430_v31  ;;  %v332_v50 = vpop.f32.mrb[7].mxu1 }
 0x1c3   :  { %v621_v52 = vpack.c.bf16 %v476_v46, %v476_v46  ;;  %v477_v53 = vmul.f32 %v420_v26, %v332_v50 }
 0x1c4   :  { %559 = vst.msk [vmem:[%s904_s5 + $0x18] sm:$0xf] %vm552_vm2, %v623_v48  ;;  %v624_v54 = vpack.c.bf16 %v479_v49, %v479_v49 }
 0x1c5   :  { %557 = vst.msk [vmem:[%s904_s5 + $0x10] sm:$0xf] %vm552_vm2, %v621_v52  ;;  %v622_v56 = vpack.c.bf16 %v477_v53, %v477_v53 }
 0x1c6   :  { %560 = vst.msk [vmem:[%s904_s5 + $0x1c] sm:$0xf] %vm552_vm2, %v624_v54 }
 0x1c7   :  { %558 = vst.msk [vmem:[%s904_s5 + $0x14] sm:$0xf] %vm552_vm2, %v622_v56  ;;  %v684_v57 = vpop.f32.mrb[8].mxu1 }
 0x1c8   :  { %v482_v58 = vmul.f32 %v684_v57, %v445_v51  ;;  %v345_v59 = vpop.f32.mrb[9].mxu1 }
 0x1c9   :  { %v480_v61 = vmul.f32 %v435_v40, %v345_v59  ;;  %v685_v62 = vpop.f32.mrb[10].mxu1 }
 0x1ca   :  { %v627_v63 = vpack.c.bf16 %v482_v58, %v482_v58  ;;  %v483_v0 = vmul.f32 %v685_v62, %v450_v55  ;;  %v348_v1 = vpop.f32.mrb[11].mxu1 }
 0x1cb   :  { %v625_v3 = vpack.c.bf16 %v480_v61, %v480_v61  ;;  %v481_v4 = vmul.f32 %v440_v42, %v348_v1 }
 0x1cc   :  { %563 = vst.msk [vmem:[%s904_s5 + $0x28] sm:$0xf] %vm552_vm2, %v627_v63  ;;  %v628_v5 = vpack.c.bf16 %v483_v0, %v483_v0 }
 0x1cd   :  { %561 = vst.msk [vmem:[%s904_s5 + $0x20] sm:$0xf] %vm552_vm2, %v625_v3  ;;  %v626_v6 = vpack.c.bf16 %v481_v4, %v481_v4 }
 0x1ce   :  { %564 = vst.msk [vmem:[%s904_s5 + $0x2c] sm:$0xf] %vm552_vm2, %v628_v5 }
 0x1cf   :  { %562 = vst.msk [vmem:[%s904_s5 + $0x24] sm:$0xf] %vm552_vm2, %v626_v6  ;;  %v688_v8 = vpop.f32.mrb[12].mxu1 }
 0x1d0   :  { %v486_v9 = vmul.f32 %v688_v8, %v465_v7  ;;  %v361_v10 = vpop.f32.mrb[13].mxu1 }
 0x1d1   :  { %v484_v12 = vmul.f32 %v455_v60, %v361_v10  ;;  %v689_v13 = vpop.f32.mrb[14].mxu1 }
 0x1d2   :  { %v631_v14 = vpack.c.bf16 %v486_v9, %v486_v9  ;;  %v487_v15 = vmul.f32 %v689_v13, %v470_v11  ;;  %v364_v16 = vpop.f32.mrb[15].mxu1 }
 0x1d3   :  { %v629_v17 = vpack.c.bf16 %v484_v12, %v484_v12  ;;  %v485_v18 = vmul.f32 %v460_v2, %v364_v16 }
 0x1d4   :  { %567 = vst.msk [vmem:[%s904_s5 + $0x38] sm:$0xf] %vm552_vm2, %v631_v14  ;;  %v632_v19 = vpack.c.bf16 %v487_v15, %v487_v15 }
 0x1d5   :  { %565 = vst.msk [vmem:[%s904_s5 + $0x30] sm:$0xf] %vm552_vm2, %v629_v17  ;;  %v630_v20 = vpack.c.bf16 %v485_v18, %v485_v18 }
 0x1d6   :  { %568 = vst.msk [vmem:[%s904_s5 + $0x3c] sm:$0xf] %vm552_vm2, %v632_v19 }
 0x1d7   :  { %566 = vst.msk [vmem:[%s904_s5 + $0x34] sm:$0xf] %vm552_vm2, %v630_v20 }

// kernel: dbpgcn_forward.5
= control target key start
LH: loop header
LB: loop body
LE: loop exit
PB: predicated region body
PF: predicated region fallthrough
CT: control target
= control target key end

     0   :  { %v760_v1 = vmov 0   ;;  %vm22_vm0 = vcmask 64512   ;;  %v761_v37 = vmov 0.0   ;;  %s1378_s1 = inlined_call_operand.vmem [shape: bf16[128,8], index: 1, kind: input, shape index: {}]   ;;  %s1379_s0 = inlined_call_operand.vmem [shape: s8[128,128], index: 0, kind: input, shape index: {}]   ;;  %s1380_s3 = inlined_call_operand.vmem [shape: f32[128,1], index: 3, kind: input, shape index: {}]   ;;  %s1381_s4 = inlined_call_operand.vmem [shape: f32[128,8], index: 4, kind: output, shape index: {}]   ;;  %s1382_s2 = inlined_call_operand.vmem [shape: f32[1,8], index: 2, kind: input, shape index: {}]  }
   0x1   :  { %v688_v0 = vld [vmem:[%s1378_s1] sm:$0xff]   ;;  %686 = vset.pattern.permute.xlu0 %v760_v1  ;;  %687 = vset.pattern.permute.xlu1 %v760_v1  ;;  %v689_v2 = vld [vmem:[%s1378_s1 + $0x8] sm:$0xff]   ;;  %v690_v3 = vld [vmem:[%s1378_s1 + $0x10] sm:$0xff]   ;;  %25 = vst.msk [vmem:[%s1381_s4 + $0x10] sm:$0xff] %vm22_vm0, %v761_v37 }
   0x2   :  { %636 = vmatprep.subr.bf16.mxu0 %v688_v0  ;;  %668 = vmatprep.subr.bf16.mxu1 %v688_v0  ;;  %v691_v4 = vld [vmem:[%s1378_s1 + $0x18] sm:$0xff]   ;;  %v802_v5 = vld [vmem:[%s1379_s0] sm:$0xff]  ;;  %v807_v6 = vld [vmem:[%s1379_s0 + $0x10] sm:$0xff]  ;;  %23 = vst.msk [vmem:[%s1381_s4] sm:$0xff] %vm22_vm0, %v761_v37 }
   0x3   :  { %637 = vmatpush3.bf16.msra.mxu0 %v688_v0  ;;  %676 = vmatpush3.bf16.msra.mxu1 %v688_v0  ;;  %v59_v7 = vunpack.c.l.s8.bf16 %v802_v5  ;;  %v63_v8 = vunpack.c.l.s8.bf16 %v807_v6  ;;  %v280_v9 = vld [vmem:[%s1380_s3] sm:$0xff]  ;;  %v282_v10 = vld [vmem:[%s1380_s3 + $0x10] sm:$0xff]  ;;  %v281_v11 = vld [vmem:[%s1380_s3 + $0x8] sm:$0xff]  ;;  %v60_v27 = vunpack.c.h.s8.bf16 %v802_v5  ;;  %v64_v28 = vunpack.c.h.s8.bf16 %v807_v6  ;;  %24 = vst.msk [vmem:[%s1381_s4 + $0x8] sm:$0xff] %vm22_vm0, %v761_v37 }
   0x4   :  { %638 = vmatprep.subr.bf16.mxu0 %v689_v2  ;;  %669 = vmatprep.subr.bf16.mxu1 %v689_v2  ;;  %v283_v12 = vld [vmem:[%s1380_s3 + $0x18] sm:$0xff]  ;;  %v692_v13 = vld [vmem:[%s1378_s1 + $0x20] sm:$0xff]   ;;  %v285_v15 = vld [vmem:[%s1380_s3 + $0x28] sm:$0xff]  ;;  %26 = vst.msk [vmem:[%s1381_s4 + $0x18] sm:$0xff] %vm22_vm0, %v761_v37 }
   0x5   :  { %298 = vperm.xlu0 %686, %v280_v9   ;;  %308 = vperm.xlu1 %687, %v282_v10   ;;  %v284_v14 = vld [vmem:[%s1380_s3 + $0x20] sm:$0xff]  ;;  %v693_v16 = vld [vmem:[%s1378_s1 + $0x28] sm:$0xff]   ;;  %v286_v17 = vld [vmem:[%s1380_s3 + $0x30] sm:$0xff]  ;;  %27 = vst.msk [vmem:[%s1381_s4 + $0x20] sm:$0xff] %vm22_vm0, %v761_v37 }
   0x6   :  { %652 = vmatprep.mubr.bf16.mxu0 %v59_v7  ;;  %660 = vmatprep.mubr.bf16.mxu1 %v63_v8  ;;  %v287_v18 = vld [vmem:[%s1380_s3 + $0x38] sm:$0xff]  ;;  %v694_v19 = vld [vmem:[%s1378_s1 + $0x30] sm:$0xff]   ;;  %v288_v20 = vld [vmem:[%s1380_s3 + $0x40] sm:$0xff]  ;;  %28 = vst.msk [vmem:[%s1381_s4 + $0x28] sm:$0xff] %vm22_vm0, %v761_v37 }
   0x7   :  { %639 = vmatpush3.bf16.msra.mxu0 %v689_v2  ;;  %677 = vmatpush3.bf16.msra.mxu1 %v689_v2  ;;  %v289_v21 = vld [vmem:[%s1380_s3 + $0x48] sm:$0xff]  ;;  %v695_v22 = vld [vmem:[%s1378_s1 + $0x38] sm:$0xff]   ;;  %v290_v23 = vld [vmem:[%s1380_s3 + $0x50] sm:$0xff]  ;;  %29 = vst.msk [vmem:[%s1381_s4 + $0x30] sm:$0xff] %vm22_vm0, %v761_v37 }
   0x8   :  { %640 = vmatprep.subr.bf16.mxu0 %v690_v3  ;;  %670 = vmatprep.subr.bf16.mxu1 %v690_v3  ;;  %v291_v24 = vld [vmem:[%s1380_s3 + $0x58] sm:$0xff]  ;;  %v56_v25 = vld [vmem:[%s1379_s0 + $0x8] sm:$0xff]  ;;  %v292_v31 = vld [vmem:[%s1380_s3 + $0x60] sm:$0xff]  ;;  %30 = vst.msk [vmem:[%s1381_s4 + $0x38] sm:$0xff] %vm22_vm0, %v761_v37 }
   0x9   :  { %303 = vperm.xlu0 %686, %v281_v11   ;;  %313 = vperm.xlu1 %687, %v283_v12   ;;  %v58_v26 = vld [vmem:[%s1379_s0 + $0x18] sm:$0xff]  ;;  %v61_v29 = vunpack.c.l.s8.bf16 %v56_v25  ;;  %v293_v32 = vld [vmem:[%s1380_s3 + $0x68] sm:$0xff]  ;;  %v294_v33 = vld [vmem:[%s1380_s3 + $0x70] sm:$0xff]  ;;  %v62_v35 = vunpack.c.h.s8.bf16 %v56_v25  ;;  %31 = vst.msk [vmem:[%s1381_s4 + $0x40] sm:$0xff] %vm22_vm0, %v761_v37 }
   0xa   :  { %v65_v30 = vunpack.c.l.s8.bf16 %v58_v26  ;;  %v295_v34 = vld [vmem:[%s1380_s3 + $0x78] sm:$0xff]  ;;  %v66_v36 = vunpack.c.h.s8.bf16 %v58_v26  ;;  %32 = vst.msk [vmem:[%s1381_s4 + $0x48] sm:$0xff] %vm22_vm0, %v761_v37  ;;  %33 = vst.msk [vmem:[%s1381_s4 + $0x50] sm:$0xff] %vm22_vm0, %v761_v37  ;;  %v41_v45 = vld [vmem:[%s1381_s4 + $0x10] sm:$0xff] }
   0xb   :  { %641 = vmatpush3.bf16.msra.mxu0 %v690_v3  ;;  %678 = vmatpush3.bf16.msra.mxu1 %v690_v3  ;;  %34 = vst.msk [vmem:[%s1381_s4 + $0x58] sm:$0xff] %vm22_vm0, %v761_v37  ;;  %35 = vst.msk [vmem:[%s1381_s4 + $0x60] sm:$0xff] %vm22_vm0, %v761_v37  ;;  %v39_v49 = vld [vmem:[%s1381_s4] sm:$0xff]  ;;  %v42_v53 = vld [vmem:[%s1381_s4 + $0x18] sm:$0xff] }
   0xc   :  { %642 = vmatprep.subr.bf16.mxu0 %v691_v4  ;;  %671 = vmatprep.subr.bf16.mxu1 %v691_v4  ;;  %36 = vst.msk [vmem:[%s1381_s4 + $0x68] sm:$0xff] %vm22_vm0, %v761_v37  ;;  %37 = vst.msk [vmem:[%s1381_s4 + $0x70] sm:$0xff] %vm22_vm0, %v761_v37  ;;  %v40_v59 = vld [vmem:[%s1381_s4 + $0x8] sm:$0xff]  ;;  %v43_v11 = vld [vmem:[%s1381_s4 + $0x20] sm:$0xff] }
   0xd   :  { %318 = vperm.xlu0 %686, %v284_v14   ;;  %323 = vperm.xlu1 %687, %v285_v15   ;;  %38 = vst.msk [vmem:[%s1381_s4 + $0x78] sm:$0xff] %vm22_vm0, %v761_v37 }
   0xe   :  { %v45_v7 = vld [vmem:[%s1381_s4 + $0x30] sm:$0xff] }
   0xf   :  { %643 = vmatpush3.bf16.msra.mxu0 %v691_v4  ;;  %679 = vmatpush3.bf16.msra.mxu1 %v691_v4  ;;  %v46_v15 = vld [vmem:[%s1381_s4 + $0x38] sm:$0xff] }
  0x10   :  { %644 = vmatprep.subr.bf16.mxu0 %v692_v13  ;;  %672 = vmatprep.subr.bf16.mxu1 %v692_v13  ;;  %v47_v50 = vld [vmem:[%s1381_s4 + $0x40] sm:$0xff] }
  0x11   :  { %328 = vperm.xlu0 %686, %v286_v17   ;;  %333 = vperm.xlu1 %687, %v287_v18   ;;  %v49_v46 = vld [vmem:[%s1381_s4 + $0x50] sm:$0xff]  ;;  %v48_v60 = vld [vmem:[%s1381_s4 + $0x48] sm:$0xff] }
  0x12   :  { %v50_v54 = vld [vmem:[%s1381_s4 + $0x58] sm:$0xff]  ;;  %v51_v12 = vld [vmem:[%s1381_s4 + $0x60] sm:$0xff] }
  0x13   :  { %645 = vmatpush3.bf16.msra.mxu0 %v692_v13  ;;  %680 = vmatpush3.bf16.msra.mxu1 %v692_v13  ;;  %v53_v8 = vld [vmem:[%s1381_s4 + $0x70] sm:$0xff] }
  0x14   :  { %646 = vmatprep.subr.bf16.mxu0 %v693_v16  ;;  %673 = vmatprep.subr.bf16.mxu1 %v693_v16 }
  0x15   :  { %338 = vperm.xlu0 %686, %v288_v20   ;;  %343 = vperm.xlu1 %687, %v289_v21   ;;  %v44_v21 = vld [vmem:[%s1381_s4 + $0x28] sm:$0xff] }
  0x17   :  { %647 = vmatpush3.bf16.msra.mxu0 %v693_v16  ;;  %681 = vmatpush3.bf16.msra.mxu1 %v693_v16  ;;  %v54_v16 = vld [vmem:[%s1381_s4 + $0x78] sm:$0xff] }
  0x18   :  { %648 = vmatprep.subr.bf16.mxu0 %v694_v19  ;;  %674 = vmatprep.subr.bf16.mxu1 %v694_v19 }
  0x19   :  { %348 = vperm.xlu0 %686, %v290_v23   ;;  %353 = vperm.xlu1 %687, %v291_v24  }
  0x1b   :  { %649 = vmatpush3.bf16.msra.mxu0 %v694_v19  ;;  %682 = vmatpush3.bf16.msra.mxu1 %v694_v19 }
  0x1c   :  { %650 = vmatprep.subr.bf16.mxu0 %v695_v22  ;;  %675 = vmatprep.subr.bf16.mxu1 %v695_v22 }
  0x1d   :  { %358 = vperm.xlu0 %686, %v292_v31   ;;  %363 = vperm.xlu1 %687, %v293_v32  }
  0x1f   :  { %651 = vmatpush3.bf16.msra.mxu0 %v695_v22  ;;  %683 = vmatpush3.bf16.msra.mxu1 %v695_v22  ;;  %v52_v22 = vld [vmem:[%s1381_s4 + $0x68] sm:$0xff] }
  0x21   :  { %368 = vperm.xlu0 %686, %v294_v33   ;;  %373 = vperm.xlu1 %687, %v295_v34  }
  0x22   :  { %653 = vmatmul.mubr.bf16.vlgmr.msra.gmra.mrb[0].mxu0 %v60_v27  ;;  %661 = vmatmul.mubr.bf16.vlgmr.msra.gmra.mrb[0].mxu1 %v64_v28  ;;  %v1049_v28 = vld [vmem:[%s1382_s2] ss:$0 sm:$0xff] }
  0x23   :  { %656 = vmatprep.mubr.bf16.mxu0 %v61_v29  ;;  %664 = vmatprep.mubr.bf16.mxu1 %v65_v30 }
  0x2a   :  { %657 = vmatmul.mubr.bf16.gmra.mrb[4].mxu0 %v62_v35  ;;  %665 = vmatmul.mubr.bf16.gmra.mrb[4].mxu1 %v66_v36 }
  0x84   :  { %v943_v38 = vpop.permute.xlu0 %298  ;;  %v945_v39 = vpop.permute.xlu1 %308 }
  0x88   :  { %v947_v40 = vpop.permute.xlu0 %303  ;;  %v949_v41 = vpop.permute.xlu1 %313 }
  0x8c   :  { %v951_v42 = vpop.permute.xlu0 %318  ;;  %v953_v43 = vpop.permute.xlu1 %323 }
  0x90   :  { %v955_v44 = vpop.permute.xlu0 %328  ;;  %v963_v47 = vpop.permute.xlu1 %333 }
  0x94   :  { %v965_v48 = vpop.permute.xlu0 %338  ;;  %v1023_v9 = vpop.permute.xlu1 %343 }
  0x98   :  { %v349_v10 = vpop.permute.xlu0 %348 }
  0xf5   :  { %v654_v51 = vpop.f32.mrb[0].mxu0  ;;  %v662_v52 = vpop.f32.mrb[0].mxu1 }
  0xf6   :  { %v230_v55 = vadd.f32 %v654_v51, %v41_v45  ;;  %v238_v56 = vadd.f32 %v662_v52, %v49_v46  ;;  %v165_v57 = vpop.f32.mrb[1].mxu0  ;;  %v197_v58 = vpop.f32.mrb[1].mxu1 }
  0xf7   :  { %v228_v61 = vadd.f32 %v165_v57, %v39_v49  ;;  %v236_v62 = vadd.f32 %v197_v58, %v47_v50  ;;  %v655_v63 = vpop.f32.mrb[2].mxu0  ;;  %v663_v0 = vpop.f32.mrb[2].mxu1 }
  0xf8   :  { %247 = vst.msk [vmem:[%s1381_s4 + $0x10] sm:$0xff] %vm22_vm0, %v230_v55  ;;  %255 = vst.msk [vmem:[%s1381_s4 + $0x50] sm:$0xff] %vm22_vm0, %v238_v56  ;;  %v231_v1 = vadd.f32 %v655_v63, %v42_v53  ;;  %v239_v2 = vadd.f32 %v663_v0, %v50_v54  ;;  %v168_v3 = vpop.f32.mrb[3].mxu0  ;;  %v200_v4 = vpop.f32.mrb[3].mxu1 }
  0xf9   :  { %245 = vst.msk [vmem:[%s1381_s4] sm:$0xff] %vm22_vm0, %v228_v61  ;;  %253 = vst.msk [vmem:[%s1381_s4 + $0x40] sm:$0xff] %vm22_vm0, %v236_v62  ;;  %v229_v5 = vadd.f32 %v168_v3, %v40_v59  ;;  %v237_v6 = vadd.f32 %v200_v4, %v48_v60  ;;  %v354_v59 = vpop.permute.xlu1 %353 }
  0xfa   :  { %248 = vst.msk [vmem:[%s1381_s4 + $0x18] sm:$0xff] %vm22_vm0, %v231_v1  ;;  %256 = vst.msk [vmem:[%s1381_s4 + $0x58] sm:$0xff] %vm22_vm0, %v239_v2 }
  0xfb   :  { %246 = vst.msk [vmem:[%s1381_s4 + $0x8] sm:$0xff] %vm22_vm0, %v229_v5  ;;  %254 = vst.msk [vmem:[%s1381_s4 + $0x48] sm:$0xff] %vm22_vm0, %v237_v6  ;;  %v359_v5 = vpop.permute.xlu0 %358 }
  0xfd   :  { %v658_v13 = vpop.f32.mrb[4].mxu0  ;;  %v666_v14 = vpop.f32.mrb[4].mxu1 }
  0xfe   :  { %v234_v17 = vadd.f32 %v658_v13, %v45_v7  ;;  %v242_v18 = vadd.f32 %v666_v14, %v53_v8  ;;  %v181_v19 = vpop.f32.mrb[5].mxu0  ;;  %v213_v20 = vpop.f32.mrb[5].mxu1 }
  0xff   :  { %v232_v23 = vadd.f32 %v181_v19, %v43_v11  ;;  %v240_v24 = vadd.f32 %v213_v20, %v51_v12  ;;  %v659_v25 = vpop.f32.mrb[6].mxu0  ;;  %v667_v26 = vpop.f32.mrb[6].mxu1  ;;  %v274_v27 = vld [vmem:[%s1381_s4 + $0x50] sm:$0xff] }
 0x100   :  { %v266_v29 = vld [vmem:[%s1381_s4 + $0x10] sm:$0xff]  ;;  %251 = vst.msk [vmem:[%s1381_s4 + $0x30] sm:$0xff] %vm22_vm0, %v234_v17  ;;  %259 = vst.msk [vmem:[%s1381_s4 + $0x70] sm:$0xff] %vm22_vm0, %v242_v18  ;;  %v235_v30 = vadd.f32 %v659_v25, %v46_v15  ;;  %v243_v31 = vadd.f32 %v667_v26, %v54_v16  ;;  %v184_v32 = vpop.f32.mrb[7].mxu0  ;;  %v216_v33 = vpop.f32.mrb[7].mxu1  ;;  %v386_v34 = vmul.f32 %v349_v10, %v274_v27  ;;  %v272_v36 = vld [vmem:[%s1381_s4 + $0x40] sm:$0xff] }
 0x101   :  { %v378_v35 = vmul.f32 %v945_v39, %v266_v29  ;;  %v264_v37 = vld [vmem:[%s1381_s4] sm:$0xff]  ;;  %249 = vst.msk [vmem:[%s1381_s4 + $0x20] sm:$0xff] %vm22_vm0, %v232_v23  ;;  %257 = vst.msk [vmem:[%s1381_s4 + $0x60] sm:$0xff] %vm22_vm0, %v240_v24  ;;  %v233_v45 = vadd.f32 %v184_v32, %v44_v21  ;;  %v241_v39 = vadd.f32 %v216_v33, %v52_v22  ;;  %v267_v50 = vld [vmem:[%s1381_s4 + $0x18] sm:$0xff]  ;;  %v369_v18 = vpop.permute.xlu0 %368  ;;  %v364_v24 = vpop.permute.xlu1 %363 }
 0x102   :  { %v384_v46 = vmul.f32 %v965_v48, %v272_v36  ;;  %v376_v49 = vmul.f32 %v943_v38, %v264_v37  ;;  %252 = vst.msk [vmem:[%s1381_s4 + $0x38] sm:$0xff] %vm22_vm0, %v235_v30  ;;  %260 = vst.msk [vmem:[%s1381_s4 + $0x78] sm:$0xff] %vm22_vm0, %v243_v31  ;;  %v1091_v51 = vadd.f32 %v1049_v28, %v386_v34  ;;  %v265_v38 = vld [vmem:[%s1381_s4 + $0x8] sm:$0xff]  ;;  %v275_v58 = vld [vmem:[%s1381_s4 + $0x58] sm:$0xff] }
 0x103   :  { %v1094_v48 = vadd.f32 %v1049_v28, %v378_v35  ;;  %250 = vst.msk [vmem:[%s1381_s4 + $0x28] sm:$0xff] %vm22_vm0, %v233_v45  ;;  %258 = vst.msk [vmem:[%s1381_s4 + $0x68] sm:$0xff] %vm22_vm0, %v241_v39  ;;  %v379_v53 = vmul.f32 %v949_v41, %v267_v50  ;;  %v377_v57 = vmul.f32 %v947_v40, %v265_v38  ;;  %v273_v1 = vld [vmem:[%s1381_s4 + $0x48] sm:$0xff] }
 0x104   :  { %v1108_v52 = vadd.f32 %v1049_v28, %v384_v46  ;;  %v445_v54 = vsel %vm22_vm0, %v1091_v51, -inf  ;;  %v1116_v56 = vadd.f32 %v1049_v28, %v376_v49  ;;  %v387_v60 = vmul.f32 %v354_v59, %v275_v58 }
 0x105   :  { %v421_v55 = vsel %vm22_vm0, %v1094_v48, -inf  ;;  %446 = vmax.xlane.f32.xlu1 %v445_v54  ;;  %v1123_v41 = vadd.f32 %v1049_v28, %v379_v53  ;;  %v1133_v63 = vadd.f32 %v1049_v28, %v377_v57  ;;  %v385_v4 = vmul.f32 %v1023_v9, %v273_v1  ;;  %v374_v32 = vpop.permute.xlu1 %373 }
 0x106   :  { %422 = vmax.xlane.f32.xlu0 %v421_v55  ;;  %v439_v62 = vsel %vm22_vm0, %v1108_v52, -inf  ;;  %v415_v40 = vsel %vm22_vm0, %v1116_v56, -inf  ;;  %v1143_v3 = vadd.f32 %v1049_v28, %v387_v60 }
 0x107   :  { %v270_v61 = vld [vmem:[%s1381_s4 + $0x30] sm:$0xff]  ;;  %v424_v6 = vsel %vm22_vm0, %v1123_v41, -inf  ;;  %v1163_v12 = vadd.f32 %v1049_v28, %v385_v4 }
 0x108   :  { %v382_v0 = vmul.f32 %v955_v44, %v270_v61  ;;  %v268_v2 = vld [vmem:[%s1381_s4 + $0x20] sm:$0xff]  ;;  %v418_v44 = vsel %vm22_vm0, %v1133_v63, -inf  ;;  %v448_v11 = vsel %vm22_vm0, %v1143_v3, -inf  ;;  %v278_v16 = vld [vmem:[%s1381_s4 + $0x70] sm:$0xff] }
 0x109   :  { %440 = vmax.xlane.f32.xlu1 %v439_v62  ;;  %v380_v8 = vmul.f32 %v951_v42, %v268_v2  ;;  %v276_v10 = vld [vmem:[%s1381_s4 + $0x60] sm:$0xff]  ;;  %v271_v9 = vld [vmem:[%s1381_s4 + $0x38] sm:$0xff]  ;;  %v442_v19 = vsel %vm22_vm0, %v1163_v12, -inf  ;;  %v390_v20 = vmul.f32 %v369_v18, %v278_v16 }
 0x10a   :  { %416 = vmax.xlane.f32.xlu0 %v415_v40  ;;  %v1151_v7 = vadd.f32 %v1049_v28, %v382_v0  ;;  %v388_v14 = vmul.f32 %v359_v5, %v276_v10  ;;  %v383_v15 = vmul.f32 %v963_v47, %v271_v9  ;;  %v269_v17 = vld [vmem:[%s1381_s4 + $0x28] sm:$0xff]  ;;  %v279_v31 = vld [vmem:[%s1381_s4 + $0x78] sm:$0xff] }
 0x10b   :  { %v1168_v42 = vadd.f32 %v1049_v28, %v380_v8  ;;  %v381_v23 = vmul.f32 %v953_v43, %v269_v17  ;;  %v277_v25 = vld [vmem:[%s1381_s4 + $0x68] sm:$0xff]  ;;  %v1192_v26 = vadd.f32 %v1049_v28, %v390_v20  ;;  %v391_v36 = vmul.f32 %v374_v32, %v279_v31 }
 0x10c   :  { %v433_v13 = vsel %vm22_vm0, %v1151_v7, -inf  ;;  %v1182_v47 = vadd.f32 %v1049_v28, %v388_v14  ;;  %v1185_v22 = vadd.f32 %v1049_v28, %v383_v15  ;;  %v389_v43 = vmul.f32 %v364_v24, %v277_v25 }
 0x10d   :  { %419 = vmax.xlane.f32.xlu1 %v418_v44  ;;  %v427_v21 = vsel %vm22_vm0, %v1168_v42, -inf  ;;  %v1199_v30 = vadd.f32 %v1049_v28, %v381_v23  ;;  %v457_v33 = vsel %vm22_vm0, %v1192_v26, -inf  ;;  %v1214_v45 = vadd.f32 %v1049_v28, %v391_v36 }
 0x10e   :  { %425 = vmax.xlane.f32.xlu0 %v424_v6  ;;  %v451_v27 = vsel %vm22_vm0, %v1182_v47, -inf  ;;  %v436_v29 = vsel %vm22_vm0, %v1185_v22, -inf  ;;  %v1209_v35 = vadd.f32 %v1049_v28, %v389_v43 }
 0x10f   :  { %v430_v34 = vsel %vm22_vm0, %v1199_v30, -inf  ;;  %v460_v39 = vsel %vm22_vm0, %v1214_v45, -inf }
 0x110   :  { %v454_v37 = vsel %vm22_vm0, %v1209_v35, -inf }
 0x111   :  { %434 = vmax.xlane.f32.xlu1 %v433_v13 }
 0x112   :  { %449 = vmax.xlane.f32.xlu0 %v448_v11 }
 0x115   :  { %428 = vmax.xlane.f32.xlu1 %v427_v21 }
 0x116   :  { %443 = vmax.xlane.f32.xlu0 %v442_v19 }
 0x119   :  { %452 = vmax.xlane.f32.xlu1 %v451_v27 }
 0x11a   :  { %437 = vmax.xlane.f32.xlu0 %v436_v29 }
 0x11d   :  { %458 = vmax.xlane.f32.xlu1 %v457_v33 }
 0x11e   :  { %431 = vmax.xlane.f32.xlu0 %v430_v34 }
 0x122   :  { %455 = vmax.xlane.f32.xlu0 %v454_v37 }
 0x126   :  { %461 = vmax.xlane.f32.xlu0 %v460_v39 }
 0x192   :  { %v447_v46 = vpop.xlane.xlu1 %446 }
 0x193   :  { %v423_v49 = vpop.xlane.xlu0 %422  ;;  %v473_v50 = vsub.f32 %v1091_v51, %v447_v46 }
 0x194   :  { %v465_v38 = vsub.f32 %v1094_v48, %v423_v49 }
 0x195   :  { %v499_v54 = vmul.f32 1.442695, %v473_v50 }
 0x196   :  { %v483_v53 = vmul.f32 1.442695, %v465_v38  ;;  %v441_v55 = vpop.xlane.xlu1 %440 }
 0x197   :  { %v417_v57 = vpop.xlane.xlu0 %416  ;;  %v471_v28 = vsub.f32 %v1108_v52, %v441_v55 }
 0x198   :  { %v463_v58 = vsub.f32 %v1116_v56, %v417_v57  ;;  %696 = vpow2.f32 %v483_v53 }
 0x199   :  { %698 = vpow2.f32 %v499_v54  ;;  %v495_v0 = vmul.f32 1.442695, %v471_v28 }
 0x19a   :  { %v479_v59 = vmul.f32 1.442695, %v463_v58  ;;  %v420_v61 = vpop.xlane.xlu1 %419 }
 0x19b   :  { %v426_v60 = vpop.xlane.xlu0 %425  ;;  %v464_v51 = vsub.f32 %v1133_v63, %v420_v61 }
 0x19c   :  { %v466_v62 = vsub.f32 %v1123_v41, %v426_v60  ;;  %700 = vpow2.f32 %v479_v59 }
 0x19d   :  { %v481_v4 = vmul.f32 1.442695, %v464_v51 }
 0x19e   :  { %v485_v40 = vmul.f32 1.442695, %v466_v62  ;;  %v435_v1 = vpop.xlane.xlu1 %434 }
 0x19f   :  { %v450_v48 = vpop.xlane.xlu0 %449  ;;  %v469_v56 = vsub.f32 %v1151_v7, %v435_v1 }
 0x1a0   :  { %702 = vpow2.f32 %v485_v40  ;;  %v474_v2 = vsub.f32 %v1143_v3, %v450_v48 }
 0x1a1   :  { %704 = vpow2.f32 %v495_v0  ;;  %v491_v6 = vmul.f32 1.442695, %v469_v56 }
 0x1a2   :  { %v501_v5 = vmul.f32 1.442695, %v474_v2  ;;  %v1226_v52 = vpop.eup %696  ;;  %v429_v41 = vpop.xlane.xlu1 %428 }
 0x1a3   :  { %v444_v44 = vpop.xlane.xlu0 %443  ;;  %v467_v8 = vsub.f32 %v1168_v42, %v429_v41  ;;  %v517_v10 = vsel %vm22_vm0, %v1226_v52, 0.0  ;;  %v1232_v9 = vpop.eup %698 }
 0x1a4   :  { %706 = vpow2.f32 %v501_v5  ;;  %v472_v63 = vsub.f32 %v1163_v12, %v444_v44  ;;  %518 = vadd.xlane.f32.xlu1 %v517_v10  ;;  %v541_v12 = vsel %vm22_vm0, %v1232_v9, 0.0 }
 0x1a5   :  { %708 = vpow2.f32 %v481_v4  ;;  %v487_v7 = vmul.f32 1.442695, %v467_v8 }
 0x1a6   :  { %v497_v3 = vmul.f32 1.442695, %v472_v63  ;;  %710 = vpow2.f32 %v491_v6  ;;  %v453_v11 = vpop.xlane.xlu1 %452  ;;  %v1238_v42 = vpop.eup %700 }
 0x1a7   :  { %v438_v13 = vpop.xlane.xlu0 %437  ;;  %v475_v14 = vsub.f32 %v1182_v47, %v453_v11  ;;  %v511_v23 = vsel %vm22_vm0, %v1238_v42, 0.0 }
 0x1a8   :  { %v470_v15 = vsub.f32 %v1185_v22, %v438_v13  ;;  %542 = vadd.xlane.f32.xlu1 %v541_v12  ;;  %712 = vpow2.f32 %v497_v3 }
 0x1a9   :  { %714 = vpow2.f32 %v487_v7  ;;  %v503_v18 = vmul.f32 1.442695, %v475_v14 }
 0x1aa   :  { %v1240_v16 = vpop.eup %702  ;;  %v493_v17 = vmul.f32 1.442695, %v470_v15  ;;  %v459_v19 = vpop.xlane.xlu1 %458 }
 0x1ab   :  { %v432_v20 = vpop.xlane.xlu0 %431  ;;  %v520_v21 = vsel %vm22_vm0, %v1240_v16, 0.0  ;;  %v477_v47 = vsub.f32 %v1192_v26, %v459_v19  ;;  %v1248_v24 = vpop.eup %704 }
 0x1ac   :  { %v468_v22 = vsub.f32 %v1199_v30, %v432_v20  ;;  %521 = vadd.xlane.f32.xlu0 %v520_v21  ;;  %512 = vadd.xlane.f32.xlu1 %v511_v23  ;;  %716 = vpow2.f32 %v493_v17  ;;  %v535_v32 = vsel %vm22_vm0, %v1248_v24, 0.0 }
 0x1ad   :  { %718 = vpow2.f32 %v503_v18  ;;  %v507_v29 = vmul.f32 1.442695, %v477_v47 }
 0x1ae   :  { %v1250_v25 = vpop.eup %706  ;;  %v489_v27 = vmul.f32 1.442695, %v468_v22 }
 0x1af   :  { %v456_v43 = vpop.xlane.xlu0 %455  ;;  %v544_v31 = vsel %vm22_vm0, %v1250_v25, 0.0  ;;  %v1254_v26 = vpop.eup %708 }
 0x1b0   :  { %v476_v30 = vsub.f32 %v1209_v35, %v456_v43  ;;  %545 = vadd.xlane.f32.xlu0 %v544_v31  ;;  %v1259_v33 = vpop.eup %710  ;;  %536 = vadd.xlane.f32.xlu1 %v535_v32  ;;  %720 = vpow2.f32 %v489_v27  ;;  %v514_v37 = vsel %vm22_vm0, %v1254_v26, 0.0 }
 0x1b1   :  { %722 = vpow2.f32 %v507_v29  ;;  %v529_v35 = vsel %vm22_vm0, %v1259_v33, 0.0 }
 0x1b2   :  { %v505_v34 = vmul.f32 1.442695, %v476_v30  ;;  %v1263_v39 = vpop.eup %712 }
 0x1b3   :  { %v462_v36 = vpop.xlane.xlu0 %461  ;;  %v1268_v49 = vpop.eup %714  ;;  %v538_v38 = vsel %vm22_vm0, %v1263_v39, 0.0 }
 0x1b4   :  { %v478_v46 = vsub.f32 %v1214_v45, %v462_v36  ;;  %515 = vadd.xlane.f32.xlu0 %v514_v37  ;;  %530 = vadd.xlane.f32.xlu1 %v529_v35  ;;  %724 = vpow2.f32 %v505_v34  ;;  %v523_v54 = vsel %vm22_vm0, %v1268_v49, 0.0 }
 0x1b6   :  { %v509_v50 = vmul.f32 1.442695, %v478_v46  ;;  %v1272_v53 = vpop.eup %716 }
 0x1b7   :  { %v1276_v55 = vpop.eup %718  ;;  %v532_v45 = vsel %vm22_vm0, %v1272_v53, 0.0 }
 0x1b8   :  { %539 = vadd.xlane.f32.xlu0 %v538_v38  ;;  %524 = vadd.xlane.f32.xlu1 %v523_v54  ;;  %726 = vpow2.f32 %v509_v50  ;;  %v547_v58 = vsel %vm22_vm0, %v1276_v55, 0.0 }
 0x1ba   :  { %v1280_v57 = vpop.eup %720 }
 0x1bb   :  { %v1284_v28 = vpop.eup %722  ;;  %v526_v59 = vsel %vm22_vm0, %v1280_v57, 0.0 }
 0x1bc   :  { %533 = vadd.xlane.f32.xlu0 %v532_v45  ;;  %548 = vadd.xlane.f32.xlu1 %v547_v58  ;;  %v553_v61 = vsel %vm22_vm0, %v1284_v28, 0.0 }
 0x1be   :  { %v1288_v60 = vpop.eup %724 }
 0x1bf   :  { %v550_v62 = vsel %vm22_vm0, %v1288_v60, 0.0 }
 0x1c0   :  { %527 = vadd.xlane.f32.xlu0 %v526_v59  ;;  %554 = vadd.xlane.f32.xlu1 %v553_v61 }
 0x1c2   :  { %v1294_v40 = vpop.eup %726 }
 0x1c3   :  { %v556_v51 = vsel %vm22_vm0, %v1294_v40, 0.0 }
 0x1c4   :  { %551 = vadd.xlane.f32.xlu0 %v550_v62 }
 0x1c8   :  { %557 = vadd.xlane.f32.xlu0 %v556_v51 }
 0x231   :  { %v519_v0 = vpop.xlane.xlu1 %518 }
 0x232   :  { %728 = vrcp.f32 %v519_v0 }
 0x235   :  { %v543_v48 = vpop.xlane.xlu1 %542 }
 0x236   :  { %730 = vrcp.f32 %v543_v48 }
 0x239   :  { %v522_v1 = vpop.xlane.xlu0 %521  ;;  %v513_v2 = vpop.xlane.xlu1 %512 }
 0x23a   :  { %732 = vrcp.f32 %v522_v1 }
 0x23b   :  { %734 = vrcp.f32 %v513_v2 }
 0x23c   :  { %v729_v56 = vpop.eup %728 }
 0x23d   :  { %v546_v4 = vpop.xlane.xlu0 %545  ;;  %v577_v5 = vmul.f32 %v729_v56, %v1226_v52  ;;  %v537_v6 = vpop.xlane.xlu1 %536 }
 0x23e   :  { %736 = vrcp.f32 %v546_v4 }
 0x23f   :  { %738 = vrcp.f32 %v537_v6  ;;  %593 = vst.msk [vmem:[%s1381_s4 + $0x10] sm:$0xff] %vm22_vm0, %v577_v5 }
 0x240   :  { %v731_v44 = vpop.eup %730 }
 0x241   :  { %v516_v41 = vpop.xlane.xlu0 %515  ;;  %v585_v63 = vmul.f32 %v731_v44, %v1232_v9  ;;  %v531_v8 = vpop.xlane.xlu1 %530 }
 0x242   :  { %740 = vrcp.f32 %v516_v41 }
 0x243   :  { %742 = vrcp.f32 %v531_v8  ;;  %601 = vst.msk [vmem:[%s1381_s4 + $0x50] sm:$0xff] %vm22_vm0, %v585_v63 }
 0x244   :  { %v733_v10 = vpop.eup %732 }
 0x245   :  { %v735_v52 = vpop.eup %734  ;;  %v578_v3 = vmul.f32 %v733_v10, %v1240_v16  ;;  %v540_v7 = vpop.xlane.xlu0 %539 }
 0x246   :  { %v575_v11 = vmul.f32 %v735_v52, %v1238_v42  ;;  %v525_v13 = vpop.xlane.xlu1 %524  ;;  %744 = vrcp.f32 %v540_v7 }
 0x247   :  { %594 = vst.msk [vmem:[%s1381_s4 + $0x18] sm:$0xff] %vm22_vm0, %v578_v3  ;;  %746 = vrcp.f32 %v525_v13 }
 0x248   :  { %v737_v9 = vpop.eup %736  ;;  %591 = vst.msk [vmem:[%s1381_s4] sm:$0xff] %vm22_vm0, %v575_v11 }
 0x249   :  { %v739_v14 = vpop.eup %738  ;;  %v586_v15 = vmul.f32 %v737_v9, %v1250_v25  ;;  %v534_v12 = vpop.xlane.xlu0 %533 }
 0x24a   :  { %v583_v42 = vmul.f32 %v739_v14, %v1248_v24  ;;  %v549_v16 = vpop.xlane.xlu1 %548  ;;  %748 = vrcp.f32 %v534_v12 }
 0x24b   :  { %602 = vst.msk [vmem:[%s1381_s4 + $0x58] sm:$0xff] %vm22_vm0, %v586_v15  ;;  %750 = vrcp.f32 %v549_v16 }
 0x24c   :  { %v741_v17 = vpop.eup %740  ;;  %599 = vst.msk [vmem:[%s1381_s4 + $0x40] sm:$0xff] %vm22_vm0, %v583_v42 }
 0x24d   :  { %v743_v18 = vpop.eup %742  ;;  %v576_v19 = vmul.f32 %v741_v17, %v1254_v26  ;;  %v528_v20 = vpop.xlane.xlu0 %527 }
 0x24e   :  { %v581_v21 = vmul.f32 %v743_v18, %v1259_v33  ;;  %v555_v47 = vpop.xlane.xlu1 %554  ;;  %752 = vrcp.f32 %v528_v20 }
 0x24f   :  { %592 = vst.msk [vmem:[%s1381_s4 + $0x8] sm:$0xff] %vm22_vm0, %v576_v19  ;;  %754 = vrcp.f32 %v555_v47 }
 0x250   :  { %v745_v22 = vpop.eup %744  ;;  %597 = vst.msk [vmem:[%s1381_s4 + $0x30] sm:$0xff] %vm22_vm0, %v581_v21 }
 0x251   :  { %v747_v23 = vpop.eup %746  ;;  %v584_v24 = vmul.f32 %v745_v22, %v1263_v39  ;;  %v552_v25 = vpop.xlane.xlu0 %551 }
 0x252   :  { %v579_v27 = vmul.f32 %v747_v23, %v1268_v49  ;;  %756 = vrcp.f32 %v552_v25 }
 0x253   :  { %600 = vst.msk [vmem:[%s1381_s4 + $0x48] sm:$0xff] %vm22_vm0, %v584_v24 }
 0x254   :  { %v749_v29 = vpop.eup %748  ;;  %595 = vst.msk [vmem:[%s1381_s4 + $0x20] sm:$0xff] %vm22_vm0, %v579_v27 }
 0x255   :  { %v751_v43 = vpop.eup %750  ;;  %v582_v31 = vmul.f32 %v749_v29, %v1272_v53  ;;  %v558_v26 = vpop.xlane.xlu0 %557 }
 0x256   :  { %v587_v30 = vmul.f32 %v751_v43, %v1276_v55  ;;  %758 = vrcp.f32 %v558_v26 }
 0x257   :  { %598 = vst.msk [vmem:[%s1381_s4 + $0x38] sm:$0xff] %vm22_vm0, %v582_v31 }
 0x258   :  { %v753_v32 = vpop.eup %752  ;;  %603 = vst.msk [vmem:[%s1381_s4 + $0x60] sm:$0xff] %vm22_vm0, %v587_v30 }
 0x259   :  { %v755_v33 = vpop.eup %754  ;;  %v580_v34 = vmul.f32 %v753_v32, %v1280_v57 }
 0x25a   :  { %v589_v36 = vmul.f32 %v755_v33, %v1284_v28 }
 0x25b   :  { %596 = vst.msk [vmem:[%s1381_s4 + $0x28] sm:$0xff] %vm22_vm0, %v580_v34 }
 0x25c   :  { %v757_v37 = vpop.eup %756  ;;  %605 = vst.msk [vmem:[%s1381_s4 + $0x70] sm:$0xff] %vm22_vm0, %v589_v36 }
 0x25d   :  { %v588_v39 = vmul.f32 %v757_v37, %v1288_v60 }
 0x25f   :  { %604 = vst.msk [vmem:[%s1381_s4 + $0x68] sm:$0xff] %vm22_vm0, %v588_v39 }
 0x260   :  { %v759_v46 = vpop.eup %758 }
 0x261   :  { %v590_v35 = vmul.f32 %v759_v46, %v1294_v40 }
 0x263   :  { %606 = vst.msk [vmem:[%s1381_s4 + $0x78] sm:$0xff] %vm22_vm0, %v590_v35 }

// kernel: dbpgcn_forward.4
= control target key start
LH: loop header
LB: loop body
LE: loop exit
PB: predicated region body
PF: predicated region fallthrough
CT: control target
= control target key end

     0   :  { %v810_v1 = vmov 0   ;;  %vm25_vm0 = vcmask 130048   ;;  %v811_v21 = vmov 0.0   ;;  %vm651_vm1 = vcmask 60416   ;;  %s1122_s1 = inlined_call_operand.vmem [shape: bf16[128,16], index: 1, kind: input, shape index: {}]   ;;  %s1123_s0 = inlined_call_operand.vmem [shape: s8[128,128], index: 0, kind: input, shape index: {}]   ;;  %s1124_s4 = inlined_call_operand.vmem [shape: f32[128,1], index: 4, kind: input, shape index: {}]   ;;  %s1125_s3 = inlined_call_operand.vmem [shape: bf16[16,8], index: 3, kind: input, shape index: {}]   ;;  %s1126_s2 = inlined_call_operand.vmem [shape: f32[1,16], index: 2, kind: input, shape index: {}]   ;;  %s1127_s5 = inlined_call_operand.vmem [shape: bf16[128,8], index: 5, kind: output, shape index: {}]  }
   0x1   :  { %v801_v0 = vld [vmem:[%s1122_s1] sm:$0xff]   ;;  %799 = vset.pattern.permute.xlu0 %v810_v1  ;;  %800 = vset.pattern.permute.xlu1 %v810_v1  ;;  %v802_v2 = vld [vmem:[%s1122_s1 + $0x8] sm:$0xff]   ;;  %v803_v3 = vld [vmem:[%s1122_s1 + $0x10] sm:$0xff]   ;;  %28 = vst.msk [vmem:[#allocation2 + $0x10] sm:$0xff] %vm25_vm0, %v811_v21 }
   0x2   :  { %747 = vmatprep.subr.bf16.mxu0 %v801_v0  ;;  %v804_v4 = vld [vmem:[%s1122_s1 + $0x18] sm:$0xff]   ;;  %v857_v5 = vld [vmem:[%s1123_s0] sm:$0xff]  ;;  %v285_v8 = vld [vmem:[%s1124_s4 + $0x10] sm:$0xff]  ;;  %26 = vst.msk [vmem:[#allocation2] sm:$0xff] %vm25_vm0, %v811_v21 }
   0x3   :  { %748 = vmatpush3.bf16.msra.mxu0 %v801_v0  ;;  %v62_v6 = vunpack.c.l.s8.bf16 %v857_v5  ;;  %v283_v7 = vld [vmem:[%s1124_s4] sm:$0xff]  ;;  %311 = vperm.xlu1 %800, %v285_v8   ;;  %v284_v9 = vld [vmem:[%s1124_s4 + $0x8] sm:$0xff]  ;;  %v286_v10 = vld [vmem:[%s1124_s4 + $0x18] sm:$0xff]  ;;  %27 = vst.msk [vmem:[#allocation2 + $0x8] sm:$0xff] %vm25_vm0, %v811_v21  ;;  %v63_v25 = vunpack.c.h.s8.bf16 %v857_v5 }
   0x4   :  { %749 = vmatprep.subr.bf16.mxu0 %v802_v2  ;;  %301 = vperm.xlu0 %799, %v283_v7   ;;  %v805_v11 = vld [vmem:[%s1122_s1 + $0x20] sm:$0xff]   ;;  %v288_v13 = vld [vmem:[%s1124_s4 + $0x28] sm:$0xff]  ;;  %v289_v15 = vld [vmem:[%s1124_s4 + $0x30] sm:$0xff]  ;;  %29 = vst.msk [vmem:[#allocation2 + $0x18] sm:$0xff] %vm25_vm0, %v811_v21 }
   0x5   :  { %763 = vmatprep.mubr.bf16.mxu0 %v62_v6  ;;  %v287_v12 = vld [vmem:[%s1124_s4 + $0x20] sm:$0xff]  ;;  %v806_v14 = vld [vmem:[%s1122_s1 + $0x28] sm:$0xff]   ;;  %v290_v16 = vld [vmem:[%s1124_s4 + $0x38] sm:$0xff]  ;;  %30 = vst.msk [vmem:[#allocation2 + $0x20] sm:$0xff] %vm25_vm0, %v811_v21 }
   0x6   :  { %v807_v17 = vld [vmem:[%s1122_s1 + $0x30] sm:$0xff]   ;;  %v291_v18 = vld [vmem:[%s1124_s4 + $0x40] sm:$0xff]  ;;  %v292_v19 = vld [vmem:[%s1124_s4 + $0x48] sm:$0xff]  ;;  %31 = vst.msk [vmem:[#allocation2 + $0x28] sm:$0xff] %vm25_vm0, %v811_v21 }
   0x7   :  { %750 = vmatpush3.bf16.msra.mxu0 %v802_v2  ;;  %316 = vperm.xlu1 %800, %v286_v10   ;;  %v808_v20 = vld [vmem:[%s1122_s1 + $0x38] sm:$0xff]   ;;  %32 = vst.msk [vmem:[#allocation2 + $0x30] sm:$0xff] %vm25_vm0, %v811_v21  ;;  %33 = vst.msk [vmem:[#allocation2 + $0x38] sm:$0xff] %vm25_vm0, %v811_v21  ;;  %v293_v22 = vld [vmem:[%s1124_s4 + $0x50] sm:$0xff] }
   0x8   :  { %751 = vmatprep.subr.bf16.mxu0 %v803_v3  ;;  %306 = vperm.xlu0 %799, %v284_v9   ;;  %34 = vst.msk [vmem:[#allocation2 + $0x40] sm:$0xff] %vm25_vm0, %v811_v21  ;;  %35 = vst.msk [vmem:[#allocation2 + $0x48] sm:$0xff] %vm25_vm0, %v811_v21  ;;  %v294_v23 = vld [vmem:[%s1124_s4 + $0x58] sm:$0xff]  ;;  %v59_v24 = vld [vmem:[%s1123_s0 + $0x8] sm:$0xff] }
   0x9   :  { %36 = vst.msk [vmem:[#allocation2 + $0x50] sm:$0xff] %vm25_vm0, %v811_v21  ;;  %37 = vst.msk [vmem:[#allocation2 + $0x58] sm:$0xff] %vm25_vm0, %v811_v21  ;;  %v64_v26 = vunpack.c.l.s8.bf16 %v59_v24  ;;  %v295_v27 = vld [vmem:[%s1124_s4 + $0x60] sm:$0xff]  ;;  %v296_v28 = vld [vmem:[%s1124_s4 + $0x68] sm:$0xff]  ;;  %v65_v32 = vunpack.c.h.s8.bf16 %v59_v24 }
   0xa   :  { %38 = vst.msk [vmem:[#allocation2 + $0x60] sm:$0xff] %vm25_vm0, %v811_v21  ;;  %39 = vst.msk [vmem:[#allocation2 + $0x68] sm:$0xff] %vm25_vm0, %v811_v21  ;;  %v297_v29 = vld [vmem:[%s1124_s4 + $0x70] sm:$0xff]  ;;  %v298_v31 = vld [vmem:[%s1124_s4 + $0x78] sm:$0xff] }
   0xb   :  { %752 = vmatpush3.bf16.msra.mxu0 %v803_v3  ;;  %326 = vperm.xlu1 %800, %v288_v13   ;;  %40 = vst.msk [vmem:[#allocation2 + $0x70] sm:$0xff] %vm25_vm0, %v811_v21  ;;  %41 = vst.msk [vmem:[#allocation2 + $0x78] sm:$0xff] %vm25_vm0, %v811_v21  ;;  %v60_v30 = vld [vmem:[%s1123_s0 + $0x10] sm:$0xff]  ;;  %v61_v34 = vld [vmem:[%s1123_s0 + $0x18] sm:$0xff] }
   0xc   :  { %753 = vmatprep.subr.bf16.mxu0 %v804_v4  ;;  %321 = vperm.xlu0 %799, %v287_v12   ;;  %v66_v33 = vunpack.c.l.s8.bf16 %v60_v30  ;;  %v67_v35 = vunpack.c.h.s8.bf16 %v60_v30  ;;  %v68_v36 = vunpack.c.l.s8.bf16 %v61_v34  ;;  %v69_v37 = vunpack.c.h.s8.bf16 %v61_v34  ;;  %v809_v38 = vld [vmem:[%s1125_s3] sm:$0xff]   ;;  %v44_v42 = vld [vmem:[#allocation2 + $0x10] sm:$0xff]  ;;  %v45_v46 = vld [vmem:[#allocation2 + $0x18] sm:$0xff] }
   0xd   :  { %779 = vmatprep.subr.bf16.mxu1 %v809_v38  ;;  %v42_v43 = vld [vmem:[#allocation2] sm:$0xff]  ;;  %v43_v49 = vld [vmem:[#allocation2 + $0x8] sm:$0xff] }
   0xe   :  { %780 = vmatpush3.bf16.msra.mxu1 %v809_v38  ;;  %v48_v57 = vld [vmem:[#allocation2 + $0x30] sm:$0xff]  ;;  %v46_v58 = vld [vmem:[#allocation2 + $0x20] sm:$0xff]  ;;  %v49_v60 = vld [vmem:[#allocation2 + $0x38] sm:$0xff] }
   0xf   :  { %754 = vmatpush3.bf16.msra.mxu0 %v804_v4  ;;  %336 = vperm.xlu1 %800, %v290_v16   ;;  %v47_v63 = vld [vmem:[#allocation2 + $0x28] sm:$0xff]  ;;  %v971_v7 = vld [vmem:[%s1126_s2] ss:$0 sm:$0xff] }
  0x10   :  { %755 = vmatprep.subr.bf16.mxu0 %v805_v11  ;;  %331 = vperm.xlu0 %799, %v289_v15   ;;  %v52_v15 = vld [vmem:[#allocation2 + $0x50] sm:$0xff] }
  0x13   :  { %756 = vmatpush3.bf16.msra.mxu0 %v805_v11  ;;  %346 = vperm.xlu1 %800, %v292_v19  }
  0x14   :  { %757 = vmatprep.subr.bf16.mxu0 %v806_v14  ;;  %341 = vperm.xlu0 %799, %v291_v18   ;;  %v50_v18 = vld [vmem:[#allocation2 + $0x40] sm:$0xff] }
  0x17   :  { %758 = vmatpush3.bf16.msra.mxu0 %v806_v14  ;;  %356 = vperm.xlu1 %800, %v294_v23   ;;  %v53_v23 = vld [vmem:[#allocation2 + $0x58] sm:$0xff] }
  0x18   :  { %759 = vmatprep.subr.bf16.mxu0 %v807_v17  ;;  %351 = vperm.xlu0 %799, %v293_v22  }
  0x1b   :  { %760 = vmatpush3.bf16.msra.mxu0 %v807_v17  ;;  %366 = vperm.xlu1 %800, %v296_v28  }
  0x1c   :  { %761 = vmatprep.subr.bf16.mxu0 %v808_v20  ;;  %361 = vperm.xlu0 %799, %v295_v27   ;;  %v51_v27 = vld [vmem:[#allocation2 + $0x48] sm:$0xff] }
  0x1f   :  { %762 = vmatpush3.bf16.msra.mxu0 %v808_v20  ;;  %376 = vperm.xlu1 %800, %v298_v31  }
  0x20   :  { %371 = vperm.xlu0 %799, %v297_v29  }
  0x22   :  { %764 = vmatmul.mubr.bf16.vlgmr.msra.gmra.mrb[0].mxu0 %v63_v25 }
  0x23   :  { %767 = vmatprep.mubr.bf16.mxu0 %v64_v26 }
  0x2a   :  { %768 = vmatmul.mubr.bf16.gmra.mrb[4].mxu0 %v65_v32 }
  0x2b   :  { %771 = vmatprep.mubr.bf16.mxu0 %v66_v33 }
  0x32   :  { %772 = vmatmul.mubr.bf16.gmra.mrb[8].mxu0 %v67_v35 }
  0x33   :  { %775 = vmatprep.mubr.bf16.mxu0 %v68_v36 }
  0x3a   :  { %776 = vmatmul.mubr.bf16.gmra.mrb[12].mxu0 %v69_v37 }
  0x82   :  { %v951_v40 = vpop.permute.xlu1 %311 }
  0x83   :  { %v949_v39 = vpop.permute.xlu0 %301 }
  0x86   :  { %v955_v44 = vpop.permute.xlu1 %316 }
  0x87   :  { %v953_v41 = vpop.permute.xlu0 %306 }
  0x8a   :  { %v962_v56 = vpop.permute.xlu1 %326 }
  0x8b   :  { %v958_v54 = vpop.permute.xlu0 %321 }
  0x8e   :  { %v974_v9 = vpop.permute.xlu1 %336 }
  0x8f   :  { %v965_v0 = vpop.permute.xlu0 %331 }
  0x92   :  { %v988_v29 = vpop.permute.xlu1 %346 }
  0x93   :  { %v985_v21 = vpop.permute.xlu0 %341 }
  0xf5   :  { %v765_v45 = vpop.f32.mrb[0].mxu0 }
  0xf6   :  { %v233_v47 = vadd.f32 %v765_v45, %v44_v42  ;;  %v168_v48 = vpop.f32.mrb[1].mxu0 }
  0xf7   :  { %v231_v50 = vadd.f32 %v168_v48, %v42_v43  ;;  %v766_v51 = vpop.f32.mrb[2].mxu0 }
  0xf8   :  { %250 = vst.msk [vmem:[#allocation2 + $0x10] sm:$0xff] %vm25_vm0, %v233_v47  ;;  %v234_v52 = vadd.f32 %v766_v51, %v45_v46  ;;  %v171_v53 = vpop.f32.mrb[3].mxu0  ;;  %v996_v51 = vpop.permute.xlu0 %351 }
  0xf9   :  { %248 = vst.msk [vmem:[#allocation2] sm:$0xff] %vm25_vm0, %v231_v50  ;;  %v232_v55 = vadd.f32 %v171_v53, %v43_v49 }
  0xfa   :  { %251 = vst.msk [vmem:[#allocation2 + $0x18] sm:$0xff] %vm25_vm0, %v234_v52  ;;  %v56_v52 = vld [vmem:[#allocation2 + $0x70] sm:$0xff] }
  0xfb   :  { %249 = vst.msk [vmem:[#allocation2 + $0x8] sm:$0xff] %vm25_vm0, %v232_v55 }
  0xfd   :  { %v769_v59 = vpop.f32.mrb[4].mxu0 }
  0xfe   :  { %v237_v61 = vadd.f32 %v769_v59, %v48_v57  ;;  %v184_v62 = vpop.f32.mrb[5].mxu0  ;;  %v54_v57 = vld [vmem:[#allocation2 + $0x60] sm:$0xff] }
  0xff   :  { %v235_v1 = vadd.f32 %v184_v62, %v46_v58  ;;  %v770_v2 = vpop.f32.mrb[6].mxu0  ;;  %v269_v3 = vld [vmem:[#allocation2 + $0x10] sm:$0xff]  ;;  %v57_v62 = vld [vmem:[#allocation2 + $0x78] sm:$0xff] }
 0x100   :  { %254 = vst.msk [vmem:[#allocation2 + $0x30] sm:$0xff] %vm25_vm0, %v237_v61  ;;  %v238_v4 = vadd.f32 %v770_v2, %v49_v60  ;;  %v187_v5 = vpop.f32.mrb[7].mxu0  ;;  %v267_v6 = vld [vmem:[#allocation2] sm:$0xff]  ;;  %v381_v8 = vmul.f32 %v951_v40, %v269_v3  ;;  %v1005_v60 = vpop.permute.xlu1 %356  ;;  %v55_v3 = vld [vmem:[#allocation2 + $0x68] sm:$0xff] }
 0x101   :  { %252 = vst.msk [vmem:[#allocation2 + $0x20] sm:$0xff] %vm25_vm0, %v235_v1  ;;  %v236_v10 = vadd.f32 %v187_v5, %v47_v63  ;;  %v379_v11 = vmul.f32 %v949_v39, %v267_v6  ;;  %v270_v12 = vld [vmem:[#allocation2 + $0x18] sm:$0xff] }
 0x102   :  { %255 = vst.msk [vmem:[#allocation2 + $0x38] sm:$0xff] %vm25_vm0, %v238_v4  ;;  %v268_v13 = vld [vmem:[#allocation2 + $0x8] sm:$0xff]  ;;  %v382_v14 = vmul.f32 %v955_v44, %v270_v12  ;;  %v404_v19 = vadd.f32 %v971_v7, %v381_v8 }
 0x103   :  { %253 = vst.msk [vmem:[#allocation2 + $0x28] sm:$0xff] %vm25_vm0, %v236_v10  ;;  %v380_v16 = vmul.f32 %v953_v41, %v268_v13  ;;  %v402_v17 = vadd.f32 %v971_v7, %v379_v11 }
 0x104   :  { %v405_v20 = vadd.f32 %v971_v7, %v382_v14  ;;  %v420_v37 = vmax.f32 %v404_v19, 0.0 }
 0x105   :  { %v773_v22 = vpop.f32.mrb[8].mxu0  ;;  %v403_v24 = vadd.f32 %v971_v7, %v380_v16  ;;  %v418_v32 = vmax.f32 %v402_v17, 0.0  ;;  %v1010_v17 = vpop.permute.xlu0 %361 }
 0x106   :  { %v241_v25 = vadd.f32 %v773_v22, %v52_v15  ;;  %v200_v26 = vpop.f32.mrb[9].mxu0  ;;  %v421_v28 = vmax.f32 %v405_v20, 0.0 }
 0x107   :  { %v239_v30 = vadd.f32 %v200_v26, %v50_v18  ;;  %v774_v31 = vpop.f32.mrb[10].mxu0  ;;  %v419_v33 = vmax.f32 %v403_v24, 0.0  ;;  %v273_v34 = vld [vmem:[#allocation2 + $0x30] sm:$0xff]  ;;  %v1016_v26 = vpop.permute.xlu1 %366 }
 0x108   :  { %258 = vst.msk [vmem:[#allocation2 + $0x50] sm:$0xff] %vm25_vm0, %v241_v25  ;;  %v242_v35 = vadd.f32 %v774_v31, %v53_v23  ;;  %v203_v36 = vpop.f32.mrb[11].mxu0  ;;  %v271_v38 = vld [vmem:[#allocation2 + $0x20] sm:$0xff]  ;;  %v385_v42 = vmul.f32 %v965_v0, %v273_v34  ;;  %v435_v48 = vpack.c.bf16 %v421_v28, %v420_v37 }
 0x109   :  { %256 = vst.msk [vmem:[#allocation2 + $0x40] sm:$0xff] %vm25_vm0, %v239_v30  ;;  %v240_v43 = vadd.f32 %v203_v36, %v51_v27  ;;  %v434_v45 = vpack.c.bf16 %v419_v33, %v418_v32  ;;  %v383_v46 = vmul.f32 %v958_v54, %v271_v38  ;;  %v274_v47 = vld [vmem:[#allocation2 + $0x38] sm:$0xff]  ;;  %v1026_v34 = vpop.permute.xlu0 %371 }
 0x10a   :  { %259 = vst.msk [vmem:[#allocation2 + $0x58] sm:$0xff] %vm25_vm0, %v242_v35  ;;  %v272_v49 = vld [vmem:[#allocation2 + $0x28] sm:$0xff]  ;;  %v386_v50 = vmul.f32 %v974_v9, %v274_v47  ;;  %v408_v58 = vadd.f32 %v971_v7, %v385_v42 }
 0x10b   :  { %257 = vst.msk [vmem:[#allocation2 + $0x48] sm:$0xff] %vm25_vm0, %v240_v43  ;;  %781 = vmatprep.mubr.msk.bf16.mxu1 %vm25_vm0, %v434_v45  ;;  %v384_v53 = vmul.f32 %v962_v56, %v272_v49  ;;  %v406_v55 = vadd.f32 %v971_v7, %v383_v46  ;;  %v1029_v45 = vpop.permute.xlu1 %376 }
 0x10c   :  { %782 = vmatmul.mubr.msk.bf16.vlgmr.msra.gmra.mrb[0].mxu1 %vm25_vm0, %v435_v48  ;;  %v409_v59 = vadd.f32 %v971_v7, %v386_v50  ;;  %v424_v14 = vmax.f32 %v408_v58, 0.0 }
 0x10d   :  { %v777_v61 = vpop.f32.mrb[12].mxu0  ;;  %v407_v63 = vadd.f32 %v971_v7, %v384_v53  ;;  %v422_v8 = vmax.f32 %v406_v55, 0.0 }
 0x10e   :  { %v245_v1 = vadd.f32 %v777_v61, %v56_v52  ;;  %v216_v2 = vpop.f32.mrb[13].mxu0  ;;  %v425_v4 = vmax.f32 %v409_v59, 0.0 }
 0x10f   :  { %v243_v5 = vadd.f32 %v216_v2, %v54_v57  ;;  %v778_v6 = vpop.f32.mrb[14].mxu0  ;;  %v423_v10 = vmax.f32 %v407_v63, 0.0  ;;  %v277_v11 = vld [vmem:[#allocation2 + $0x50] sm:$0xff] }
 0x110   :  { %262 = vst.msk [vmem:[#allocation2 + $0x70] sm:$0xff] %vm25_vm0, %v245_v1  ;;  %v246_v12 = vadd.f32 %v778_v6, %v57_v62  ;;  %v219_v13 = vpop.f32.mrb[15].mxu0  ;;  %v275_v15 = vld [vmem:[#allocation2 + $0x40] sm:$0xff]  ;;  %v389_v16 = vmul.f32 %v996_v51, %v277_v11  ;;  %v437_v23 = vpack.c.bf16 %v425_v4, %v424_v14 }
 0x111   :  { %260 = vst.msk [vmem:[#allocation2 + $0x60] sm:$0xff] %vm25_vm0, %v243_v5  ;;  %v244_v18 = vadd.f32 %v219_v13, %v55_v3  ;;  %v436_v19 = vpack.c.bf16 %v423_v10, %v422_v8  ;;  %v387_v20 = vmul.f32 %v985_v21, %v275_v15  ;;  %v278_v22 = vld [vmem:[#allocation2 + $0x58] sm:$0xff] }
 0x112   :  { %263 = vst.msk [vmem:[#allocation2 + $0x78] sm:$0xff] %vm25_vm0, %v246_v12  ;;  %v276_v24 = vld [vmem:[#allocation2 + $0x48] sm:$0xff]  ;;  %v390_v25 = vmul.f32 %v1005_v60, %v278_v22  ;;  %v412_v30 = vadd.f32 %v971_v7, %v389_v16 }
 0x113   :  { %261 = vst.msk [vmem:[#allocation2 + $0x68] sm:$0xff] %vm25_vm0, %v244_v18  ;;  %785 = vmatprep.mubr.msk.bf16.mxu1 %vm25_vm0, %v436_v19  ;;  %v388_v27 = vmul.f32 %v988_v29, %v276_v24  ;;  %v410_v28 = vadd.f32 %v971_v7, %v387_v20 }
 0x114   :  { %786 = vmatmul.mubr.msk.bf16.gmra.mrb[4].mxu1 %vm25_vm0, %v437_v23  ;;  %v413_v31 = vadd.f32 %v971_v7, %v390_v25  ;;  %v428_v38 = vmax.f32 %v412_v30, 0.0 }
 0x115   :  { %v411_v32 = vadd.f32 %v971_v7, %v388_v27  ;;  %v426_v35 = vmax.f32 %v410_v28, 0.0 }
 0x116   :  { %v429_v33 = vmax.f32 %v413_v31, 0.0 }
 0x117   :  { %v427_v36 = vmax.f32 %v411_v32, 0.0  ;;  %v281_v37 = vld [vmem:[#allocation2 + $0x70] sm:$0xff] }
 0x118   :  { %v279_v42 = vld [vmem:[#allocation2 + $0x60] sm:$0xff]  ;;  %v393_v43 = vmul.f32 %v1026_v34, %v281_v37  ;;  %v439_v49 = vpack.c.bf16 %v429_v33, %v428_v38 }
 0x119   :  { %v438_v46 = vpack.c.bf16 %v427_v36, %v426_v35  ;;  %v391_v47 = vmul.f32 %v1010_v17, %v279_v42  ;;  %v282_v48 = vld [vmem:[#allocation2 + $0x78] sm:$0xff] }
 0x11a   :  { %v280_v50 = vld [vmem:[#allocation2 + $0x68] sm:$0xff]  ;;  %v394_v52 = vmul.f32 %v1029_v45, %v282_v48  ;;  %v416_v57 = vadd.f32 %v971_v7, %v393_v43 }
 0x11b   :  { %789 = vmatprep.mubr.msk.bf16.mxu1 %vm25_vm0, %v438_v46  ;;  %v392_v53 = vmul.f32 %v1016_v26, %v280_v50  ;;  %v414_v55 = vadd.f32 %v971_v7, %v391_v47 }
 0x11c   :  { %790 = vmatmul.mubr.msk.bf16.gmra.mrb[8].mxu1 %vm25_vm0, %v439_v49  ;;  %v417_v58 = vadd.f32 %v971_v7, %v394_v52  ;;  %v432_v1 = vmax.f32 %v416_v57, 0.0 }
 0x11d   :  { %v415_v59 = vadd.f32 %v971_v7, %v392_v53  ;;  %v430_v62 = vmax.f32 %v414_v55, 0.0 }
 0x11e   :  { %v433_v61 = vmax.f32 %v417_v58, 0.0 }
 0x11f   :  { %v431_v63 = vmax.f32 %v415_v59, 0.0 }
 0x120   :  { %v441_v3 = vpack.c.bf16 %v433_v61, %v432_v1 }
 0x121   :  { %v440_v2 = vpack.c.bf16 %v431_v63, %v430_v62 }
 0x123   :  { %793 = vmatprep.mubr.msk.bf16.mxu1 %vm25_vm0, %v440_v2 }
 0x124   :  { %794 = vmatmul.mubr.msk.bf16.gmra.mrb[12].mxu1 %vm25_vm0, %v441_v3 }
 0x1df   :  { %v783_v4 = vpop.f32.mrb[0].mxu1 }
 0x1e0   :  { %v573_v5 = vmul.f32 %v783_v4, %v951_v40  ;;  %v508_v6 = vpop.f32.mrb[1].mxu1 }
 0x1e1   :  { %v571_v8 = vmul.f32 %v508_v6, %v949_v39  ;;  %v784_v10 = vpop.f32.mrb[2].mxu1 }
 0x1e2   :  { %v708_v11 = vpack.c.bf16 %v573_v5, %v573_v5  ;;  %v574_v7 = vmul.f32 %v784_v10, %v955_v44  ;;  %v511_v12 = vpop.f32.mrb[3].mxu1 }
 0x1e3   :  { %v706_v13 = vpack.c.bf16 %v571_v8, %v571_v8  ;;  %v572_v14 = vmul.f32 %v511_v12, %v953_v41 }
 0x1e4   :  { %654 = vst.msk [vmem:[%s1127_s5 + $0x8] sm:$0xf] %vm651_vm1, %v708_v11  ;;  %v709_v15 = vpack.c.bf16 %v574_v7, %v574_v7 }
 0x1e5   :  { %652 = vst.msk [vmem:[%s1127_s5] sm:$0xf] %vm651_vm1, %v706_v13  ;;  %v707_v39 = vpack.c.bf16 %v572_v14, %v572_v14 }
 0x1e6   :  { %655 = vst.msk [vmem:[%s1127_s5 + $0xc] sm:$0xf] %vm651_vm1, %v709_v15 }
 0x1e7   :  { %653 = vst.msk [vmem:[%s1127_s5 + $0x4] sm:$0xf] %vm651_vm1, %v707_v39  ;;  %v787_v40 = vpop.f32.mrb[4].mxu1 }
 0x1e8   :  { %v577_v41 = vmul.f32 %v787_v40, %v965_v0  ;;  %v524_v44 = vpop.f32.mrb[5].mxu1 }
 0x1e9   :  { %v575_v16 = vmul.f32 %v524_v44, %v958_v54  ;;  %v788_v18 = vpop.f32.mrb[6].mxu1 }
 0x1ea   :  { %v712_v19 = vpack.c.bf16 %v577_v41, %v577_v41  ;;  %v578_v20 = vmul.f32 %v788_v18, %v974_v9  ;;  %v527_v22 = vpop.f32.mrb[7].mxu1 }
 0x1eb   :  { %v710_v23 = vpack.c.bf16 %v575_v16, %v575_v16  ;;  %v576_v24 = vmul.f32 %v527_v22, %v962_v56 }
 0x1ec   :  { %658 = vst.msk [vmem:[%s1127_s5 + $0x18] sm:$0xf] %vm651_vm1, %v712_v19  ;;  %v713_v25 = vpack.c.bf16 %v578_v20, %v578_v20 }
 0x1ed   :  { %656 = vst.msk [vmem:[%s1127_s5 + $0x10] sm:$0xf] %vm651_vm1, %v710_v23  ;;  %v711_v54 = vpack.c.bf16 %v576_v24, %v576_v24 }
 0x1ee   :  { %659 = vst.msk [vmem:[%s1127_s5 + $0x1c] sm:$0xf] %vm651_vm1, %v713_v25 }
 0x1ef   :  { %657 = vst.msk [vmem:[%s1127_s5 + $0x14] sm:$0xf] %vm651_vm1, %v711_v54  ;;  %v791_v56 = vpop.f32.mrb[8].mxu1 }
 0x1f0   :  { %v581_v0 = vmul.f32 %v791_v56, %v996_v51  ;;  %v540_v9 = vpop.f32.mrb[9].mxu1 }
 0x1f1   :  { %v579_v27 = vmul.f32 %v540_v9, %v985_v21  ;;  %v792_v28 = vpop.f32.mrb[10].mxu1 }
 0x1f2   :  { %v716_v30 = vpack.c.bf16 %v581_v0, %v581_v0  ;;  %v582_v31 = vmul.f32 %v792_v28, %v1005_v60  ;;  %v543_v32 = vpop.f32.mrb[11].mxu1 }
 0x1f3   :  { %v714_v33 = vpack.c.bf16 %v579_v27, %v579_v27  ;;  %v580_v35 = vmul.f32 %v543_v32, %v988_v29 }
 0x1f4   :  { %662 = vst.msk [vmem:[%s1127_s5 + $0x28] sm:$0xf] %vm651_vm1, %v716_v30  ;;  %v717_v36 = vpack.c.bf16 %v582_v31, %v582_v31 }
 0x1f5   :  { %660 = vst.msk [vmem:[%s1127_s5 + $0x20] sm:$0xf] %vm651_vm1, %v714_v33  ;;  %v715_v21 = vpack.c.bf16 %v580_v35, %v580_v35 }
 0x1f6   :  { %663 = vst.msk [vmem:[%s1127_s5 + $0x2c] sm:$0xf] %vm651_vm1, %v717_v36 }
 0x1f7   :  { %661 = vst.msk [vmem:[%s1127_s5 + $0x24] sm:$0xf] %vm651_vm1, %v715_v21  ;;  %v795_v29 = vpop.f32.mrb[12].mxu1 }
 0x1f8   :  { %v585_v51 = vmul.f32 %v795_v29, %v1026_v34  ;;  %v556_v60 = vpop.f32.mrb[13].mxu1 }
 0x1f9   :  { %v583_v37 = vmul.f32 %v556_v60, %v1010_v17  ;;  %v796_v38 = vpop.f32.mrb[14].mxu1 }
 0x1fa   :  { %v720_v42 = vpack.c.bf16 %v585_v51, %v585_v51  ;;  %v586_v43 = vmul.f32 %v796_v38, %v1029_v45  ;;  %v559_v46 = vpop.f32.mrb[15].mxu1 }
 0x1fb   :  { %v718_v47 = vpack.c.bf16 %v583_v37, %v583_v37  ;;  %v584_v48 = vmul.f32 %v559_v46, %v1016_v26 }
 0x1fc   :  { %666 = vst.msk [vmem:[%s1127_s5 + $0x38] sm:$0xf] %vm651_vm1, %v720_v42  ;;  %v721_v49 = vpack.c.bf16 %v586_v43, %v586_v43 }
 0x1fd   :  { %664 = vst.msk [vmem:[%s1127_s5 + $0x30] sm:$0xf] %vm651_vm1, %v718_v47  ;;  %v719_v17 = vpack.c.bf16 %v584_v48, %v584_v48 }
 0x1fe   :  { %667 = vst.msk [vmem:[%s1127_s5 + $0x3c] sm:$0xf] %vm651_vm1, %v721_v49 }
 0x1ff   :  { %665 = vst.msk [vmem:[%s1127_s5 + $0x34] sm:$0xf] %vm651_vm1, %v719_v17 }

</bundles_post_ra>
